<compile_context>
chip_gen: v7x
topology: tpu7x:2x2x1
jax: 0.10.0
libtpu: 0.0.40
codegen_flags: <defaults>
</compile_context>

<pallas_src>
import functools

import jax
import jax.numpy as jnp
from jax.experimental import pallas as pl
from jax.experimental.pallas import tpu as pltpu


def _embed_ln_kernel(tok_ids_sref, pos_ids_sref,          # SMEM scalar-prefetch (n_pad,)
                     tok_hbm, pos_ref, gb_ref,            # HBM token table, VMEM pos table, (2,H) LN params
                     out_ref,                             # (TILE_N, H) output tile
                     tok_buf, pos_buf, sems,              # VMEM gather buffers + 2 DMA sems
                     *, tile_n, n_chunks, eps):
    chunk = tile_n // n_chunks
    base = pl.multiple_of(pl.program_id(0) * tile_n, tile_n)

    # LN params loaded once per tile (hoisted out of the chunk loop).
    gamma = gb_ref[0:1, :].astype(jnp.float32)
    beta = gb_ref[1:2, :].astype(jnp.float32)

    def issue_chunk(c):
        # Fire `chunk` token-row gather DMAs on semaphore slot c & 1; all concurrently in flight.
        sem = sems.at[c & 1]
        start = c * chunk                                  # static Python int

        def body(r, carry):
            row = start + r
            tok_id = tok_ids_sref[base + row]
            pltpu.make_async_copy(tok_hbm.at[tok_id], tok_buf.at[row], sem).start()
            return carry

        jax.lax.fori_loop(0, chunk, body, 0, unroll=min(chunk, 16))

    def gather_pos(c):
        # Position table is VMEM-resident: plain dynamic row reads, no DMA descriptors.
        start = c * chunk

        def body(r, carry):
            row = start + r
            pid = pos_ids_sref[base + row]
            pos_buf[row, :] = pos_ref[pid, :]
            return carry

        jax.lax.fori_loop(0, chunk, body, 0, unroll=min(chunk, 8))

    def wait_chunk(c):
        # One aggregate wait: descriptor covers the whole chunk's destination rows, so its
        # byte count equals the sum of all row copies signaled on this semaphore.
        dst = tok_buf.at[pl.ds(c * chunk, chunk)]
        pltpu.make_async_copy(dst, dst, sems.at[c & 1]).wait()

    def compute_chunk(c):
        sl = pl.ds(c * chunk, chunk)                       # static slice
        x = tok_buf[sl, :].astype(jnp.float32) + pos_buf[sl, :].astype(jnp.float32)
        # One-pass LayerNorm statistics: var = E[x^2] - mean^2 (biased, like nn.LayerNorm).
        inv_h = 1.0 / x.shape[-1]
        mean = jnp.sum(x, axis=-1, keepdims=True) * inv_h
        ex2 = jnp.sum(x * x, axis=-1, keepdims=True) * inv_h
        var = ex2 - mean * mean
        y = (x - mean) * jax.lax.rsqrt(var + eps)
        # TODO(synk): nn.Dropout is identity in eval mode; training-mode dropout would use
        # pltpu.prng_seed / pltpu.prng_random_bits here.
        out_ref[sl, :] = (y * gamma + beta).astype(out_ref.dtype)

    # Intra-tile pipeline: issue chunk c+1's DMAs, gather positions for chunk c (overlaps the
    # in-flight token DMAs), then wait + add + LayerNorm chunk c.
    issue_chunk(0)
    for c in range(n_chunks):
        if c + 1 < n_chunks:
            issue_chunk(c + 1)
        gather_pos(c)
        wait_chunk(c)
        compute_chunk(c)


def roberta_embedding(token_ids, position_ids, tok_table, pos_table, gamma, beta,
                      *, eps=1e-5, tile_n=512, n_chunks=4):
    B, S = token_ids.shape
    _, H = tok_table.shape
    POS = pos_table.shape[0]
    assert tile_n % n_chunks == 0, "tile_n must be divisible by n_chunks"

    N = B * S
    n_tiles = pl.cdiv(N, tile_n)
    n_pad = n_tiles * tile_n

    tok_flat = token_ids.reshape(N).astype(jnp.int32)
    pos_flat = position_ids.reshape(N).astype(jnp.int32)
    if n_pad != N:
        # Padded rows gather row 0 (always a valid row) and are sliced off below.
        tok_flat = jnp.pad(tok_flat, (0, n_pad - N))
        pos_flat = jnp.pad(pos_flat, (0, n_pad - N))

    gb = jnp.stack([gamma, beta], axis=0).astype(jnp.float32)     # fused (2, H) LN params
    out_dtype = tok_table.dtype

    # VMEM budget derived from actual buffer sizes (+ f32 LN temporaries) with headroom;
    # stays well under v7x's 64 MiB at the default tile_n.
    tok_isz = jnp.dtype(tok_table.dtype).itemsize
    pos_isz = jnp.dtype(pos_table.dtype).itemsize
    out_isz = jnp.dtype(out_dtype).itemsize
    chunk = tile_n // n_chunks
    vmem_bytes = (
        2 * tile_n * H * out_isz          # double-buffered output tile
        + 2 * POS * H * pos_isz           # VMEM-resident position table (double-buffered spec)
        + 2 * 2 * H * 4                   # fused gamma/beta
        + tile_n * H * tok_isz            # token gather buffer
        + tile_n * H * pos_isz            # position gather buffer
        + 4 * chunk * H * 4               # f32 LN temporaries per chunk
    )
    vmem_limit = min(max(int(vmem_bytes * 1.5) + (2 << 20), 16 << 20), 48 << 20)

    kernel = functools.partial(_embed_ln_kernel, tile_n=tile_n, n_chunks=n_chunks, eps=eps)
    out = pl.pallas_call(
        kernel,
        out_shape=jax.ShapeDtypeStruct((n_pad, H), out_dtype),
        grid_spec=pltpu.PrefetchScalarGridSpec(
            num_scalar_prefetch=2,                        # token ids + position ids -> SMEM
            grid=(n_tiles,),
            in_specs=[
                pl.BlockSpec(memory_space=pl.ANY),                    # token table: HBM row gather
                pl.BlockSpec((POS, H), lambda i, tok, pos: (0, 0)),   # position table: VMEM resident
                pl.BlockSpec((2, H), lambda i, tok, pos: (0, 0)),     # fused gamma/beta
            ],
            out_specs=pl.BlockSpec((tile_n, H), lambda i, tok, pos: (i, 0)),
            scratch_shapes=[
                pltpu.VMEM((tile_n, H), tok_table.dtype),
                pltpu.VMEM((tile_n, H), pos_table.dtype),
                pltpu.SemaphoreType.DMA((2,)),
            ],
        ),
        compiler_params=pltpu.CompilerParams(
            dimension_semantics=("parallel",),            # self-contained tiles -> v7x megacore
            vmem_limit_bytes=vmem_limit,
        ),
    )(tok_flat, pos_flat, tok_table, pos_table, gb)

    return out[:N].reshape(B, S, H)


def _reference(token_ids, position_ids, tok_table, pos_table, gamma, beta, eps=1e-5):
    x = tok_table[token_ids] + pos_table[position_ids]
    mean = jnp.mean(x, axis=-1, keepdims=True)
    var = jnp.mean((x - mean) ** 2, axis=-1, keepdims=True)
    return (x - mean) * jax.lax.rsqrt(var + eps) * gamma + beta


if __name__ == "__main__":
    # synthetic config (small): vocab=100, position_size=64, hidden=128
    VOCAB, POS, HIDDEN = 100, 64, 128
    PAD_ID = 1
    B, S = 2, 10
    TILE_N = 16          # small tile for the demo: 2 grid steps (last one padded)
    N_CHUNKS = 2         # 8-row sub-chunks -> exercises the intra-tile pipeline

    key = jax.random.PRNGKey(0)
    k_tok, k_pos, k_ids = jax.random.split(key, 3)

    tok_table = 0.02 * jax.random.normal(k_tok, (VOCAB, HIDDEN), dtype=jnp.float32)
    pos_table = 0.02 * jax.random.normal(k_pos, (POS, HIDDEN), dtype=jnp.float32)
    # padding_idx rows are zero-initialized, as in nn.Embedding(padding_idx=...)
    tok_table = tok_table.at[PAD_ID].set(0.0)
    pos_table = pos_table.at[PAD_ID].set(0.0)

    # nn.LayerNorm default init
    gamma = jnp.ones((HIDDEN,), jnp.float32)
    beta = jnp.zeros((HIDDEN,), jnp.float32)

    token_ids = jax.random.randint(k_ids, (B, S), 0, VOCAB, dtype=jnp.int32)
    position_ids = (jnp.arange(S, dtype=jnp.int32)[None, :] + 2).repeat(B, axis=0)

    out = roberta_embedding(token_ids, position_ids, tok_table, pos_table, gamma, beta,
                            tile_n=TILE_N, n_chunks=N_CHUNKS)
    out = jax.block_until_ready(out)

    ref = _reference(token_ids, position_ids, tok_table, pos_table, gamma, beta)
    assert out.shape == (B, S, HIDDEN)
    assert jnp.allclose(out, ref, atol=1e-4, rtol=1e-4), "mismatch vs reference"

    print("KERNEL_OK")
</pallas_src>

<mosaic_0001>
module attributes {stable_mosaic.version = 11 : i64} {
  func.func @_embed_ln_kernel(%arg0: i32, %arg1: memref<32xi32, #tpu.memory_space<smem>>, %arg2: memref<32xi32, #tpu.memory_space<smem>>, %arg3: memref<100x128xf32, #tpu.memory_space<any>>, %arg4: memref<64x128xf32, #tpu.memory_space<vmem>>, %arg5: memref<2x128xf32, #tpu.memory_space<vmem>>, %arg6: memref<16x128xf32, #tpu.memory_space<vmem>>, %arg7: memref<16x128xf32, #tpu.memory_space<vmem>>, %arg8: memref<16x128xf32, #tpu.memory_space<vmem>>, %arg9: memref<2x!tpu.dma_semaphore, #tpu.memory_space<semaphore_mem>>) attributes {dimension_semantics = [#tpu.dimension_semantics<parallel>], iteration_bounds = array<i64: 2>, scalar_prefetch = 2 : i64, scratch_operands = 3 : i64, tpu.core_type = #tpu.core_type<tc>, window_params = [{}, {pipeline_mode = #tpu.pipeline_mode<synchronous>, transform_indices = @transform_1, window_bounds = array<i64: 64, 128>}, {pipeline_mode = #tpu.pipeline_mode<synchronous>, transform_indices = @transform_2, window_bounds = array<i64: 2, 128>}, {transform_indices = @transform_3, window_bounds = array<i64: 16, 128>}]} {
    %c16_i32 = arith.constant 16 : i32
    %0 = arith.muli %arg0, %c16_i32 : i32
    %1 = tpu.assume_multiple %0, 16 : i32
    %c0 = arith.constant 0 : index
    %c0_0 = arith.constant 0 : index
    %2 = vector.load %arg5[%c0, %c0_0] : memref<2x128xf32, #tpu.memory_space<vmem>>, vector<1x128xf32>
    %c1 = arith.constant 1 : index
    %c0_1 = arith.constant 0 : index
    %3 = vector.load %arg5[%c1, %c0_1] : memref<2x128xf32, #tpu.memory_space<vmem>>, vector<1x128xf32>
    %c0_i32 = arith.constant 0 : i32
    %c0_i32_2 = arith.constant 0 : i32
    %c0_i32_3 = arith.constant 0 : i32
    %4 = arith.addi %c0_i32_3, %c0_i32_2 : i32
    %5 = arith.addi %1, %4 : i32
    %6 = arith.index_cast %5 : i32 to index
    %7 = memref.load %arg1[%6] : memref<32xi32, #tpu.memory_space<smem>>
    %c0_i32_4 = arith.constant 0 : i32
    %8 = tpu.memref_slice %arg3[%7, %c0_i32_4] : memref<100x128xf32, #tpu.memory_space<any>> -> memref<1x128xf32, #tpu.memory_space<any>>
    %9 = tpu.memref_squeeze %8 : memref<1x128xf32, #tpu.memory_space<any>> -> memref<128xf32, #tpu.memory_space<any>>
    %c0_i32_5 = arith.constant 0 : i32
    %10 = tpu.memref_slice %arg7[%4, %c0_i32_5] : memref<16x128xf32, #tpu.memory_space<vmem>> -> memref<1x128xf32, #tpu.memory_space<vmem>>
    %11 = tpu.memref_squeeze %10 : memref<1x128xf32, #tpu.memory_space<vmem>> -> memref<128xf32, #tpu.memory_space<vmem>>
    %12 = tpu.memref_slice %arg9[%c0_i32] : memref<2x!tpu.dma_semaphore, #tpu.memory_space<semaphore_mem>> -> memref<1x!tpu.dma_semaphore, #tpu.memory_space<semaphore_mem>>
    %13 = tpu.memref_squeeze %12 : memref<1x!tpu.dma_semaphore, #tpu.memory_space<semaphore_mem>> -> memref<!tpu.dma_semaphore, #tpu.memory_space<semaphore_mem>>
    tpu.enqueue_dma source(%9 : memref<128xf32, #tpu.memory_space<any>>) target(%11 : memref<128xf32, #tpu.memory_space<vmem>>) target_semaphore(%13 : memref<!tpu.dma_semaphore, #tpu.memory_space<semaphore_mem>>)
    %c1_i32 = arith.constant 1 : i32
    %c0_i32_6 = arith.constant 0 : i32
    %14 = arith.addi %c0_i32_6, %c1_i32 : i32
    %15 = arith.addi %1, %14 : i32
    %16 = arith.index_cast %15 : i32 to index
    %17 = memref.load %arg1[%16] : memref<32xi32, #tpu.memory_space<smem>>
    %c0_i32_7 = arith.constant 0 : i32
    %18 = tpu.memref_slice %arg3[%17, %c0_i32_7] : memref<100x128xf32, #tpu.memory_space<any>> -> memref<1x128xf32, #tpu.memory_space<any>>
    %19 = tpu.memref_squeeze %18 : memref<1x128xf32, #tpu.memory_space<any>> -> memref<128xf32, #tpu.memory_space<any>>
    %c0_i32_8 = arith.constant 0 : i32
    %20 = tpu.memref_slice %arg7[%14, %c0_i32_8] : memref<16x128xf32, #tpu.memory_space<vmem>> -> memref<1x128xf32, #tpu.memory_space<vmem>>
    %21 = tpu.memref_squeeze %20 : memref<1x128xf32, #tpu.memory_space<vmem>> -> memref<128xf32, #tpu.memory_space<vmem>>
    %22 = tpu.memref_slice %arg9[%c0_i32] : memref<2x!tpu.dma_semaphore, #tpu.memory_space<semaphore_mem>> -> memref<1x!tpu.dma_semaphore, #tpu.memory_space<semaphore_mem>>
    %23 = tpu.memref_squeeze %22 : memref<1x!tpu.dma_semaphore, #tpu.memory_space<semaphore_mem>> -> memref<!tpu.dma_semaphore, #tpu.memory_space<semaphore_mem>>
    tpu.enqueue_dma source(%19 : memref<128xf32, #tpu.memory_space<any>>) target(%21 : memref<128xf32, #tpu.memory_space<vmem>>) target_semaphore(%23 : memref<!tpu.dma_semaphore, #tpu.memory_space<semaphore_mem>>)
    %c2_i32 = arith.constant 2 : i32
    %c0_i32_9 = arith.constant 0 : i32
    %24 = arith.addi %c0_i32_9, %c2_i32 : i32
    %25 = arith.addi %1, %24 : i32
    %26 = arith.index_cast %25 : i32 to index
    %27 = memref.load %arg1[%26] : memref<32xi32, #tpu.memory_space<smem>>
    %c0_i32_10 = arith.constant 0 : i32
    %28 = tpu.memref_slice %arg3[%27, %c0_i32_10] : memref<100x128xf32, #tpu.memory_space<any>> -> memref<1x128xf32, #tpu.memory_space<any>>
    %29 = tpu.memref_squeeze %28 : memref<1x128xf32, #tpu.memory_space<any>> -> memref<128xf32, #tpu.memory_space<any>>
    %c0_i32_11 = arith.constant 0 : i32
    %30 = tpu.memref_slice %arg7[%24, %c0_i32_11] : memref<16x128xf32, #tpu.memory_space<vmem>> -> memref<1x128xf32, #tpu.memory_space<vmem>>
    %31 = tpu.memref_squeeze %30 : memref<1x128xf32, #tpu.memory_space<vmem>> -> memref<128xf32, #tpu.memory_space<vmem>>
    %32 = tpu.memref_slice %arg9[%c0_i32] : memref<2x!tpu.dma_semaphore, #tpu.memory_space<semaphore_mem>> -> memref<1x!tpu.dma_semaphore, #tpu.memory_space<semaphore_mem>>
    %33 = tpu.memref_squeeze %32 : memref<1x!tpu.dma_semaphore, #tpu.memory_space<semaphore_mem>> -> memref<!tpu.dma_semaphore, #tpu.memory_space<semaphore_mem>>
    tpu.enqueue_dma source(%29 : memref<128xf32, #tpu.memory_space<any>>) target(%31 : memref<128xf32, #tpu.memory_space<vmem>>) target_semaphore(%33 : memref<!tpu.dma_semaphore, #tpu.memory_space<semaphore_mem>>)
    %c3_i32 = arith.constant 3 : i32
    %c0_i32_12 = arith.constant 0 : i32
    %34 = arith.addi %c0_i32_12, %c3_i32 : i32
    %35 = arith.addi %1, %34 : i32
    %36 = arith.index_cast %35 : i32 to index
    %37 = memref.load %arg1[%36] : memref<32xi32, #tpu.memory_space<smem>>
    %c0_i32_13 = arith.constant 0 : i32
    %38 = tpu.memref_slice %arg3[%37, %c0_i32_13] : memref<100x128xf32, #tpu.memory_space<any>> -> memref<1x128xf32, #tpu.memory_space<any>>
    %39 = tpu.memref_squeeze %38 : memref<1x128xf32, #tpu.memory_space<any>> -> memref<128xf32, #tpu.memory_space<any>>
    %c0_i32_14 = arith.constant 0 : i32
    %40 = tpu.memref_slice %arg7[%34, %c0_i32_14] : memref<16x128xf32, #tpu.memory_space<vmem>> -> memref<1x128xf32, #tpu.memory_space<vmem>>
    %41 = tpu.memref_squeeze %40 : memref<1x128xf32, #tpu.memory_space<vmem>> -> memref<128xf32, #tpu.memory_space<vmem>>
    %42 = tpu.memref_slice %arg9[%c0_i32] : memref<2x!tpu.dma_semaphore, #tpu.memory_space<semaphore_mem>> -> memref<1x!tpu.dma_semaphore, #tpu.memory_space<semaphore_mem>>
    %43 = tpu.memref_squeeze %42 : memref<1x!tpu.dma_semaphore, #tpu.memory_space<semaphore_mem>> -> memref<!tpu.dma_semaphore, #tpu.memory_space<semaphore_mem>>
    tpu.enqueue_dma source(%39 : memref<128xf32, #tpu.memory_space<any>>) target(%41 : memref<128xf32, #tpu.memory_space<vmem>>) target_semaphore(%43 : memref<!tpu.dma_semaphore, #tpu.memory_space<semaphore_mem>>)
    %c4_i32 = arith.constant 4 : i32
    %c0_i32_15 = arith.constant 0 : i32
    %44 = arith.addi %c0_i32_15, %c4_i32 : i32
    %45 = arith.addi %1, %44 : i32
    %46 = arith.index_cast %45 : i32 to index
    %47 = memref.load %arg1[%46] : memref<32xi32, #tpu.memory_space<smem>>
    %c0_i32_16 = arith.constant 0 : i32
    %48 = tpu.memref_slice %arg3[%47, %c0_i32_16] : memref<100x128xf32, #tpu.memory_space<any>> -> memref<1x128xf32, #tpu.memory_space<any>>
    %49 = tpu.memref_squeeze %48 : memref<1x128xf32, #tpu.memory_space<any>> -> memref<128xf32, #tpu.memory_space<any>>
    %c0_i32_17 = arith.constant 0 : i32
    %50 = tpu.memref_slice %arg7[%44, %c0_i32_17] : memref<16x128xf32, #tpu.memory_space<vmem>> -> memref<1x128xf32, #tpu.memory_space<vmem>>
    %51 = tpu.memref_squeeze %50 : memref<1x128xf32, #tpu.memory_space<vmem>> -> memref<128xf32, #tpu.memory_space<vmem>>
    %52 = tpu.memref_slice %arg9[%c0_i32] : memref<2x!tpu.dma_semaphore, #tpu.memory_space<semaphore_mem>> -> memref<1x!tpu.dma_semaphore, #tpu.memory_space<semaphore_mem>>
    %53 = tpu.memref_squeeze %52 : memref<1x!tpu.dma_semaphore, #tpu.memory_space<semaphore_mem>> -> memref<!tpu.dma_semaphore, #tpu.memory_space<semaphore_mem>>
    tpu.enqueue_dma source(%49 : memref<128xf32, #tpu.memory_space<any>>) target(%51 : memref<128xf32, #tpu.memory_space<vmem>>) target_semaphore(%53 : memref<!tpu.dma_semaphore, #tpu.memory_space<semaphore_mem>>)
    %c5_i32 = arith.constant 5 : i32
    %c0_i32_18 = arith.constant 0 : i32
    %54 = arith.addi %c0_i32_18, %c5_i32 : i32
    %55 = arith.addi %1, %54 : i32
    %56 = arith.index_cast %55 : i32 to index
    %57 = memref.load %arg1[%56] : memref<32xi32, #tpu.memory_space<smem>>
    %c0_i32_19 = arith.constant 0 : i32
    %58 = tpu.memref_slice %arg3[%57, %c0_i32_19] : memref<100x128xf32, #tpu.memory_space<any>> -> memref<1x128xf32, #tpu.memory_space<any>>
    %59 = tpu.memref_squeeze %58 : memref<1x128xf32, #tpu.memory_space<any>> -> memref<128xf32, #tpu.memory_space<any>>
    %c0_i32_20 = arith.constant 0 : i32
    %60 = tpu.memref_slice %arg7[%54, %c0_i32_20] : memref<16x128xf32, #tpu.memory_space<vmem>> -> memref<1x128xf32, #tpu.memory_space<vmem>>
    %61 = tpu.memref_squeeze %60 : memref<1x128xf32, #tpu.memory_space<vmem>> -> memref<128xf32, #tpu.memory_space<vmem>>
    %62 = tpu.memref_slice %arg9[%c0_i32] : memref<2x!tpu.dma_semaphore, #tpu.memory_space<semaphore_mem>> -> memref<1x!tpu.dma_semaphore, #tpu.memory_space<semaphore_mem>>
    %63 = tpu.memref_squeeze %62 : memref<1x!tpu.dma_semaphore, #tpu.memory_space<semaphore_mem>> -> memref<!tpu.dma_semaphore, #tpu.memory_space<semaphore_mem>>
    tpu.enqueue_dma source(%59 : memref<128xf32, #tpu.memory_space<any>>) target(%61 : memref<128xf32, #tpu.memory_space<vmem>>) target_semaphore(%63 : memref<!tpu.dma_semaphore, #tpu.memory_space<semaphore_mem>>)
    %c6_i32 = arith.constant 6 : i32
    %c0_i32_21 = arith.constant 0 : i32
    %64 = arith.addi %c0_i32_21, %c6_i32 : i32
    %65 = arith.addi %1, %64 : i32
    %66 = arith.index_cast %65 : i32 to index
    %67 = memref.load %arg1[%66] : memref<32xi32, #tpu.memory_space<smem>>
    %c0_i32_22 = arith.constant 0 : i32
    %68 = tpu.memref_slice %arg3[%67, %c0_i32_22] : memref<100x128xf32, #tpu.memory_space<any>> -> memref<1x128xf32, #tpu.memory_space<any>>
    %69 = tpu.memref_squeeze %68 : memref<1x128xf32, #tpu.memory_space<any>> -> memref<128xf32, #tpu.memory_space<any>>
    %c0_i32_23 = arith.constant 0 : i32
    %70 = tpu.memref_slice %arg7[%64, %c0_i32_23] : memref<16x128xf32, #tpu.memory_space<vmem>> -> memref<1x128xf32, #tpu.memory_space<vmem>>
    %71 = tpu.memref_squeeze %70 : memref<1x128xf32, #tpu.memory_space<vmem>> -> memref<128xf32, #tpu.memory_space<vmem>>
    %72 = tpu.memref_slice %arg9[%c0_i32] : memref<2x!tpu.dma_semaphore, #tpu.memory_space<semaphore_mem>> -> memref<1x!tpu.dma_semaphore, #tpu.memory_space<semaphore_mem>>
    %73 = tpu.memref_squeeze %72 : memref<1x!tpu.dma_semaphore, #tpu.memory_space<semaphore_mem>> -> memref<!tpu.dma_semaphore, #tpu.memory_space<semaphore_mem>>
    tpu.enqueue_dma source(%69 : memref<128xf32, #tpu.memory_space<any>>) target(%71 : memref<128xf32, #tpu.memory_space<vmem>>) target_semaphore(%73 : memref<!tpu.dma_semaphore, #tpu.memory_space<semaphore_mem>>)
    %c7_i32 = arith.constant 7 : i32
    %c0_i32_24 = arith.constant 0 : i32
    %74 = arith.addi %c0_i32_24, %c7_i32 : i32
    %75 = arith.addi %1, %74 : i32
    %76 = arith.index_cast %75 : i32 to index
    %77 = memref.load %arg1[%76] : memref<32xi32, #tpu.memory_space<smem>>
    %c0_i32_25 = arith.constant 0 : i32
    %78 = tpu.memref_slice %arg3[%77, %c0_i32_25] : memref<100x128xf32, #tpu.memory_space<any>> -> memref<1x128xf32, #tpu.memory_space<any>>
    %79 = tpu.memref_squeeze %78 : memref<1x128xf32, #tpu.memory_space<any>> -> memref<128xf32, #tpu.memory_space<any>>
    %c0_i32_26 = arith.constant 0 : i32
    %80 = tpu.memref_slice %arg7[%74, %c0_i32_26] : memref<16x128xf32, #tpu.memory_space<vmem>> -> memref<1x128xf32, #tpu.memory_space<vmem>>
    %81 = tpu.memref_squeeze %80 : memref<1x128xf32, #tpu.memory_space<vmem>> -> memref<128xf32, #tpu.memory_space<vmem>>
    %82 = tpu.memref_slice %arg9[%c0_i32] : memref<2x!tpu.dma_semaphore, #tpu.memory_space<semaphore_mem>> -> memref<1x!tpu.dma_semaphore, #tpu.memory_space<semaphore_mem>>
    %83 = tpu.memref_squeeze %82 : memref<1x!tpu.dma_semaphore, #tpu.memory_space<semaphore_mem>> -> memref<!tpu.dma_semaphore, #tpu.memory_space<semaphore_mem>>
    tpu.enqueue_dma source(%79 : memref<128xf32, #tpu.memory_space<any>>) target(%81 : memref<128xf32, #tpu.memory_space<vmem>>) target_semaphore(%83 : memref<!tpu.dma_semaphore, #tpu.memory_space<semaphore_mem>>)
    %c8_i32 = arith.constant 8 : i32
    %c1_i32_27 = arith.constant 1 : i32
    %c0_i32_28 = arith.constant 0 : i32
    %c8_i32_29 = arith.constant 8 : i32
    %84 = arith.addi %c8_i32_29, %c0_i32_28 : i32
    %85 = arith.addi %1, %84 : i32
    %86 = arith.index_cast %85 : i32 to index
    %87 = memref.load %arg1[%86] : memref<32xi32, #tpu.memory_space<smem>>
    %c0_i32_30 = arith.constant 0 : i32
    %88 = tpu.memref_slice %arg3[%87, %c0_i32_30] : memref<100x128xf32, #tpu.memory_space<any>> -> memref<1x128xf32, #tpu.memory_space<any>>
    %89 = tpu.memref_squeeze %88 : memref<1x128xf32, #tpu.memory_space<any>> -> memref<128xf32, #tpu.memory_space<any>>
    %c0_i32_31 = arith.constant 0 : i32
    %90 = tpu.memref_slice %arg7[%84, %c0_i32_31] : memref<16x128xf32, #tpu.memory_space<vmem>> -> memref<1x128xf32, #tpu.memory_space<vmem>>
    %91 = tpu.memref_squeeze %90 : memref<1x128xf32, #tpu.memory_space<vmem>> -> memref<128xf32, #tpu.memory_space<vmem>>
    %92 = tpu.memref_slice %arg9[%c1_i32_27] : memref<2x!tpu.dma_semaphore, #tpu.memory_space<semaphore_mem>> -> memref<1x!tpu.dma_semaphore, #tpu.memory_space<semaphore_mem>>
    %93 = tpu.memref_squeeze %92 : memref<1x!tpu.dma_semaphore, #tpu.memory_space<semaphore_mem>> -> memref<!tpu.dma_semaphore, #tpu.memory_space<semaphore_mem>>
    tpu.enqueue_dma source(%89 : memref<128xf32, #tpu.memory_space<any>>) target(%91 : memref<128xf32, #tpu.memory_space<vmem>>) target_semaphore(%93 : memref<!tpu.dma_semaphore, #tpu.memory_space<semaphore_mem>>)
    %c1_i32_32 = arith.constant 1 : i32
    %c8_i32_33 = arith.constant 8 : i32
    %94 = arith.addi %c8_i32_33, %c1_i32_32 : i32
    %95 = arith.addi %1, %94 : i32
    %96 = arith.index_cast %95 : i32 to index
    %97 = memref.load %arg1[%96] : memref<32xi32, #tpu.memory_space<smem>>
    %c0_i32_34 = arith.constant 0 : i32
    %98 = tpu.memref_slice %arg3[%97, %c0_i32_34] : memref<100x128xf32, #tpu.memory_space<any>> -> memref<1x128xf32, #tpu.memory_space<any>>
    %99 = tpu.memref_squeeze %98 : memref<1x128xf32, #tpu.memory_space<any>> -> memref<128xf32, #tpu.memory_space<any>>
    %c0_i32_35 = arith.constant 0 : i32
    %100 = tpu.memref_slice %arg7[%94, %c0_i32_35] : memref<16x128xf32, #tpu.memory_space<vmem>> -> memref<1x128xf32, #tpu.memory_space<vmem>>
    %101 = tpu.memref_squeeze %100 : memref<1x128xf32, #tpu.memory_space<vmem>> -> memref<128xf32, #tpu.memory_space<vmem>>
    %102 = tpu.memref_slice %arg9[%c1_i32_27] : memref<2x!tpu.dma_semaphore, #tpu.memory_space<semaphore_mem>> -> memref<1x!tpu.dma_semaphore, #tpu.memory_space<semaphore_mem>>
    %103 = tpu.memref_squeeze %102 : memref<1x!tpu.dma_semaphore, #tpu.memory_space<semaphore_mem>> -> memref<!tpu.dma_semaphore, #tpu.memory_space<semaphore_mem>>
    tpu.enqueue_dma source(%99 : memref<128xf32, #tpu.memory_space<any>>) target(%101 : memref<128xf32, #tpu.memory_space<vmem>>) target_semaphore(%103 : memref<!tpu.dma_semaphore, #tpu.memory_space<semaphore_mem>>)
    %c2_i32_36 = arith.constant 2 : i32
    %c8_i32_37 = arith.constant 8 : i32
    %104 = arith.addi %c8_i32_37, %c2_i32_36 : i32
    %105 = arith.addi %1, %104 : i32
    %106 = arith.index_cast %105 : i32 to index
    %107 = memref.load %arg1[%106] : memref<32xi32, #tpu.memory_space<smem>>
    %c0_i32_38 = arith.constant 0 : i32
    %108 = tpu.memref_slice %arg3[%107, %c0_i32_38] : memref<100x128xf32, #tpu.memory_space<any>> -> memref<1x128xf32, #tpu.memory_space<any>>
    %109 = tpu.memref_squeeze %108 : memref<1x128xf32, #tpu.memory_space<any>> -> memref<128xf32, #tpu.memory_space<any>>
    %c0_i32_39 = arith.constant 0 : i32
    %110 = tpu.memref_slice %arg7[%104, %c0_i32_39] : memref<16x128xf32, #tpu.memory_space<vmem>> -> memref<1x128xf32, #tpu.memory_space<vmem>>
    %111 = tpu.memref_squeeze %110 : memref<1x128xf32, #tpu.memory_space<vmem>> -> memref<128xf32, #tpu.memory_space<vmem>>
    %112 = tpu.memref_slice %arg9[%c1_i32_27] : memref<2x!tpu.dma_semaphore, #tpu.memory_space<semaphore_mem>> -> memref<1x!tpu.dma_semaphore, #tpu.memory_space<semaphore_mem>>
    %113 = tpu.memref_squeeze %112 : memref<1x!tpu.dma_semaphore, #tpu.memory_space<semaphore_mem>> -> memref<!tpu.dma_semaphore, #tpu.memory_space<semaphore_mem>>
    tpu.enqueue_dma source(%109 : memref<128xf32, #tpu.memory_space<any>>) target(%111 : memref<128xf32, #tpu.memory_space<vmem>>) target_semaphore(%113 : memref<!tpu.dma_semaphore, #tpu.memory_space<semaphore_mem>>)
    %c3_i32_40 = arith.constant 3 : i32
    %c8_i32_41 = arith.constant 8 : i32
    %114 = arith.addi %c8_i32_41, %c3_i32_40 : i32
    %115 = arith.addi %1, %114 : i32
    %116 = arith.index_cast %115 : i32 to index
    %117 = memref.load %arg1[%116] : memref<32xi32, #tpu.memory_space<smem>>
    %c0_i32_42 = arith.constant 0 : i32
    %118 = tpu.memref_slice %arg3[%117, %c0_i32_42] : memref<100x128xf32, #tpu.memory_space<any>> -> memref<1x128xf32, #tpu.memory_space<any>>
    %119 = tpu.memref_squeeze %118 : memref<1x128xf32, #tpu.memory_space<any>> -> memref<128xf32, #tpu.memory_space<any>>
    %c0_i32_43 = arith.constant 0 : i32
    %120 = tpu.memref_slice %arg7[%114, %c0_i32_43] : memref<16x128xf32, #tpu.memory_space<vmem>> -> memref<1x128xf32, #tpu.memory_space<vmem>>
    %121 = tpu.memref_squeeze %120 : memref<1x128xf32, #tpu.memory_space<vmem>> -> memref<128xf32, #tpu.memory_space<vmem>>
    %122 = tpu.memref_slice %arg9[%c1_i32_27] : memref<2x!tpu.dma_semaphore, #tpu.memory_space<semaphore_mem>> -> memref<1x!tpu.dma_semaphore, #tpu.memory_space<semaphore_mem>>
    %123 = tpu.memref_squeeze %122 : memref<1x!tpu.dma_semaphore, #tpu.memory_space<semaphore_mem>> -> memref<!tpu.dma_semaphore, #tpu.memory_space<semaphore_mem>>
    tpu.enqueue_dma source(%119 : memref<128xf32, #tpu.memory_space<any>>) target(%121 : memref<128xf32, #tpu.memory_space<vmem>>) target_semaphore(%123 : memref<!tpu.dma_semaphore, #tpu.memory_space<semaphore_mem>>)
    %c4_i32_44 = arith.constant 4 : i32
    %c8_i32_45 = arith.constant 8 : i32
    %124 = arith.addi %c8_i32_45, %c4_i32_44 : i32
    %125 = arith.addi %1, %124 : i32
    %126 = arith.index_cast %125 : i32 to index
    %127 = memref.load %arg1[%126] : memref<32xi32, #tpu.memory_space<smem>>
    %c0_i32_46 = arith.constant 0 : i32
    %128 = tpu.memref_slice %arg3[%127, %c0_i32_46] : memref<100x128xf32, #tpu.memory_space<any>> -> memref<1x128xf32, #tpu.memory_space<any>>
    %129 = tpu.memref_squeeze %128 : memref<1x128xf32, #tpu.memory_space<any>> -> memref<128xf32, #tpu.memory_space<any>>
    %c0_i32_47 = arith.constant 0 : i32
    %130 = tpu.memref_slice %arg7[%124, %c0_i32_47] : memref<16x128xf32, #tpu.memory_space<vmem>> -> memref<1x128xf32, #tpu.memory_space<vmem>>
    %131 = tpu.memref_squeeze %130 : memref<1x128xf32, #tpu.memory_space<vmem>> -> memref<128xf32, #tpu.memory_space<vmem>>
    %132 = tpu.memref_slice %arg9[%c1_i32_27] : memref<2x!tpu.dma_semaphore, #tpu.memory_space<semaphore_mem>> -> memref<1x!tpu.dma_semaphore, #tpu.memory_space<semaphore_mem>>
    %133 = tpu.memref_squeeze %132 : memref<1x!tpu.dma_semaphore, #tpu.memory_space<semaphore_mem>> -> memref<!tpu.dma_semaphore, #tpu.memory_space<semaphore_mem>>
    tpu.enqueue_dma source(%129 : memref<128xf32, #tpu.memory_space<any>>) target(%131 : memref<128xf32, #tpu.memory_space<vmem>>) target_semaphore(%133 : memref<!tpu.dma_semaphore, #tpu.memory_space<semaphore_mem>>)
    %c5_i32_48 = arith.constant 5 : i32
    %c8_i32_49 = arith.constant 8 : i32
    %134 = arith.addi %c8_i32_49, %c5_i32_48 : i32
    %135 = arith.addi %1, %134 : i32
    %136 = arith.index_cast %135 : i32 to index
    %137 = memref.load %arg1[%136] : memref<32xi32, #tpu.memory_space<smem>>
    %c0_i32_50 = arith.constant 0 : i32
    %138 = tpu.memref_slice %arg3[%137, %c0_i32_50] : memref<100x128xf32, #tpu.memory_space<any>> -> memref<1x128xf32, #tpu.memory_space<any>>
    %139 = tpu.memref_squeeze %138 : memref<1x128xf32, #tpu.memory_space<any>> -> memref<128xf32, #tpu.memory_space<any>>
    %c0_i32_51 = arith.constant 0 : i32
    %140 = tpu.memref_slice %arg7[%134, %c0_i32_51] : memref<16x128xf32, #tpu.memory_space<vmem>> -> memref<1x128xf32, #tpu.memory_space<vmem>>
    %141 = tpu.memref_squeeze %140 : memref<1x128xf32, #tpu.memory_space<vmem>> -> memref<128xf32, #tpu.memory_space<vmem>>
    %142 = tpu.memref_slice %arg9[%c1_i32_27] : memref<2x!tpu.dma_semaphore, #tpu.memory_space<semaphore_mem>> -> memref<1x!tpu.dma_semaphore, #tpu.memory_space<semaphore_mem>>
    %143 = tpu.memref_squeeze %142 : memref<1x!tpu.dma_semaphore, #tpu.memory_space<semaphore_mem>> -> memref<!tpu.dma_semaphore, #tpu.memory_space<semaphore_mem>>
    tpu.enqueue_dma source(%139 : memref<128xf32, #tpu.memory_space<any>>) target(%141 : memref<128xf32, #tpu.memory_space<vmem>>) target_semaphore(%143 : memref<!tpu.dma_semaphore, #tpu.memory_space<semaphore_mem>>)
    %c6_i32_52 = arith.constant 6 : i32
    %c8_i32_53 = arith.constant 8 : i32
    %144 = arith.addi %c8_i32_53, %c6_i32_52 : i32
    %145 = arith.addi %1, %144 : i32
    %146 = arith.index_cast %145 : i32 to index
    %147 = memref.load %arg1[%146] : memref<32xi32, #tpu.memory_space<smem>>
    %c0_i32_54 = arith.constant 0 : i32
    %148 = tpu.memref_slice %arg3[%147, %c0_i32_54] : memref<100x128xf32, #tpu.memory_space<any>> -> memref<1x128xf32, #tpu.memory_space<any>>
    %149 = tpu.memref_squeeze %148 : memref<1x128xf32, #tpu.memory_space<any>> -> memref<128xf32, #tpu.memory_space<any>>
    %c0_i32_55 = arith.constant 0 : i32
    %150 = tpu.memref_slice %arg7[%144, %c0_i32_55] : memref<16x128xf32, #tpu.memory_space<vmem>> -> memref<1x128xf32, #tpu.memory_space<vmem>>
    %151 = tpu.memref_squeeze %150 : memref<1x128xf32, #tpu.memory_space<vmem>> -> memref<128xf32, #tpu.memory_space<vmem>>
    %152 = tpu.memref_slice %arg9[%c1_i32_27] : memref<2x!tpu.dma_semaphore, #tpu.memory_space<semaphore_mem>> -> memref<1x!tpu.dma_semaphore, #tpu.memory_space<semaphore_mem>>
    %153 = tpu.memref_squeeze %152 : memref<1x!tpu.dma_semaphore, #tpu.memory_space<semaphore_mem>> -> memref<!tpu.dma_semaphore, #tpu.memory_space<semaphore_mem>>
    tpu.enqueue_dma source(%149 : memref<128xf32, #tpu.memory_space<any>>) target(%151 : memref<128xf32, #tpu.memory_space<vmem>>) target_semaphore(%153 : memref<!tpu.dma_semaphore, #tpu.memory_space<semaphore_mem>>)
    %c7_i32_56 = arith.constant 7 : i32
    %c8_i32_57 = arith.constant 8 : i32
    %154 = arith.addi %c8_i32_57, %c7_i32_56 : i32
    %155 = arith.addi %1, %154 : i32
    %156 = arith.index_cast %155 : i32 to index
    %157 = memref.load %arg1[%156] : memref<32xi32, #tpu.memory_space<smem>>
    %c0_i32_58 = arith.constant 0 : i32
    %158 = tpu.memref_slice %arg3[%157, %c0_i32_58] : memref<100x128xf32, #tpu.memory_space<any>> -> memref<1x128xf32, #tpu.memory_space<any>>
    %159 = tpu.memref_squeeze %158 : memref<1x128xf32, #tpu.memory_space<any>> -> memref<128xf32, #tpu.memory_space<any>>
    %c0_i32_59 = arith.constant 0 : i32
    %160 = tpu.memref_slice %arg7[%154, %c0_i32_59] : memref<16x128xf32, #tpu.memory_space<vmem>> -> memref<1x128xf32, #tpu.memory_space<vmem>>
    %161 = tpu.memref_squeeze %160 : memref<1x128xf32, #tpu.memory_space<vmem>> -> memref<128xf32, #tpu.memory_space<vmem>>
    %162 = tpu.memref_slice %arg9[%c1_i32_27] : memref<2x!tpu.dma_semaphore, #tpu.memory_space<semaphore_mem>> -> memref<1x!tpu.dma_semaphore, #tpu.memory_space<semaphore_mem>>
    %163 = tpu.memref_squeeze %162 : memref<1x!tpu.dma_semaphore, #tpu.memory_space<semaphore_mem>> -> memref<!tpu.dma_semaphore, #tpu.memory_space<semaphore_mem>>
    tpu.enqueue_dma source(%159 : memref<128xf32, #tpu.memory_space<any>>) target(%161 : memref<128xf32, #tpu.memory_space<vmem>>) target_semaphore(%163 : memref<!tpu.dma_semaphore, #tpu.memory_space<semaphore_mem>>)
    %c8_i32_60 = arith.constant 8 : i32
    %c0_i32_61 = arith.constant 0 : i32
    %c0_i32_62 = arith.constant 0 : i32
    %164 = arith.addi %c0_i32_62, %c0_i32_61 : i32
    %165 = arith.addi %1, %164 : i32
    %166 = arith.index_cast %165 : i32 to index
    %167 = memref.load %arg2[%166] : memref<32xi32, #tpu.memory_space<smem>>
    %168 = arith.index_cast %167 : i32 to index
    %c0_63 = arith.constant 0 : index
    %169 = vector.load %arg4[%168, %c0_63] : memref<64x128xf32, #tpu.memory_space<vmem>>, vector<1x128xf32>
    %170 = vector.shape_cast %169 : vector<1x128xf32> to vector<128xf32>
    %171 = arith.index_cast %164 : i32 to index
    %c0_64 = arith.constant 0 : index
    %172 = vector.load %arg8[%171, %c0_64] : memref<16x128xf32, #tpu.memory_space<vmem>>, vector<1x128xf32>
    %173 = vector.shape_cast %172 : vector<1x128xf32> to vector<128xf32>
    %174 = vector.shape_cast %170 : vector<128xf32> to vector<1x128xf32>
    tpu.vector_store %arg8[%171, %c0_64], %174 {strides = array<i32>} : memref<16x128xf32, #tpu.memory_space<vmem>>, vector<1x128xf32>,
    %c1_i32_65 = arith.constant 1 : i32
    %c0_i32_66 = arith.constant 0 : i32
    %175 = arith.addi %c0_i32_66, %c1_i32_65 : i32
    %176 = arith.addi %1, %175 : i32
    %177 = arith.index_cast %176 : i32 to index
    %178 = memref.load %arg2[%177] : memref<32xi32, #tpu.memory_space<smem>>
    %179 = arith.index_cast %178 : i32 to index
    %c0_67 = arith.constant 0 : index
    %180 = vector.load %arg4[%179, %c0_67] : memref<64x128xf32, #tpu.memory_space<vmem>>, vector<1x128xf32>
    %181 = vector.shape_cast %180 : vector<1x128xf32> to vector<128xf32>
    %182 = arith.index_cast %175 : i32 to index
    %c0_68 = arith.constant 0 : index
    %183 = vector.load %arg8[%182, %c0_68] : memref<16x128xf32, #tpu.memory_space<vmem>>, vector<1x128xf32>
    %184 = vector.shape_cast %183 : vector<1x128xf32> to vector<128xf32>
    %185 = vector.shape_cast %181 : vector<128xf32> to vector<1x128xf32>
    tpu.vector_store %arg8[%182, %c0_68], %185 {strides = array<i32>} : memref<16x128xf32, #tpu.memory_space<vmem>>, vector<1x128xf32>,
    %c2_i32_69 = arith.constant 2 : i32
    %c0_i32_70 = arith.constant 0 : i32
    %186 = arith.addi %c0_i32_70, %c2_i32_69 : i32
    %187 = arith.addi %1, %186 : i32
    %188 = arith.index_cast %187 : i32 to index
    %189 = memref.load %arg2[%188] : memref<32xi32, #tpu.memory_space<smem>>
    %190 = arith.index_cast %189 : i32 to index
    %c0_71 = arith.constant 0 : index
    %191 = vector.load %arg4[%190, %c0_71] : memref<64x128xf32, #tpu.memory_space<vmem>>, vector<1x128xf32>
    %192 = vector.shape_cast %191 : vector<1x128xf32> to vector<128xf32>
    %193 = arith.index_cast %186 : i32 to index
    %c0_72 = arith.constant 0 : index
    %194 = vector.load %arg8[%193, %c0_72] : memref<16x128xf32, #tpu.memory_space<vmem>>, vector<1x128xf32>
    %195 = vector.shape_cast %194 : vector<1x128xf32> to vector<128xf32>
    %196 = vector.shape_cast %192 : vector<128xf32> to vector<1x128xf32>
    tpu.vector_store %arg8[%193, %c0_72], %196 {strides = array<i32>} : memref<16x128xf32, #tpu.memory_space<vmem>>, vector<1x128xf32>,
    %c3_i32_73 = arith.constant 3 : i32
    %c0_i32_74 = arith.constant 0 : i32
    %197 = arith.addi %c0_i32_74, %c3_i32_73 : i32
    %198 = arith.addi %1, %197 : i32
    %199 = arith.index_cast %198 : i32 to index
    %200 = memref.load %arg2[%199] : memref<32xi32, #tpu.memory_space<smem>>
    %201 = arith.index_cast %200 : i32 to index
    %c0_75 = arith.constant 0 : index
    %202 = vector.load %arg4[%201, %c0_75] : memref<64x128xf32, #tpu.memory_space<vmem>>, vector<1x128xf32>
    %203 = vector.shape_cast %202 : vector<1x128xf32> to vector<128xf32>
    %204 = arith.index_cast %197 : i32 to index
    %c0_76 = arith.constant 0 : index
    %205 = vector.load %arg8[%204, %c0_76] : memref<16x128xf32, #tpu.memory_space<vmem>>, vector<1x128xf32>
    %206 = vector.shape_cast %205 : vector<1x128xf32> to vector<128xf32>
    %207 = vector.shape_cast %203 : vector<128xf32> to vector<1x128xf32>
    tpu.vector_store %arg8[%204, %c0_76], %207 {strides = array<i32>} : memref<16x128xf32, #tpu.memory_space<vmem>>, vector<1x128xf32>,
    %c4_i32_77 = arith.constant 4 : i32
    %c0_i32_78 = arith.constant 0 : i32
    %208 = arith.addi %c0_i32_78, %c4_i32_77 : i32
    %209 = arith.addi %1, %208 : i32
    %210 = arith.index_cast %209 : i32 to index
    %211 = memref.load %arg2[%210] : memref<32xi32, #tpu.memory_space<smem>>
    %212 = arith.index_cast %211 : i32 to index
    %c0_79 = arith.constant 0 : index
    %213 = vector.load %arg4[%212, %c0_79] : memref<64x128xf32, #tpu.memory_space<vmem>>, vector<1x128xf32>
    %214 = vector.shape_cast %213 : vector<1x128xf32> to vector<128xf32>
    %215 = arith.index_cast %208 : i32 to index
    %c0_80 = arith.constant 0 : index
    %216 = vector.load %arg8[%215, %c0_80] : memref<16x128xf32, #tpu.memory_space<vmem>>, vector<1x128xf32>
    %217 = vector.shape_cast %216 : vector<1x128xf32> to vector<128xf32>
    %218 = vector.shape_cast %214 : vector<128xf32> to vector<1x128xf32>
    tpu.vector_store %arg8[%215, %c0_80], %218 {strides = array<i32>} : memref<16x128xf32, #tpu.memory_space<vmem>>, vector<1x128xf32>,
    %c5_i32_81 = arith.constant 5 : i32
    %c0_i32_82 = arith.constant 0 : i32
    %219 = arith.addi %c0_i32_82, %c5_i32_81 : i32
    %220 = arith.addi %1, %219 : i32
    %221 = arith.index_cast %220 : i32 to index
    %222 = memref.load %arg2[%221] : memref<32xi32, #tpu.memory_space<smem>>
    %223 = arith.index_cast %222 : i32 to index
    %c0_83 = arith.constant 0 : index
    %224 = vector.load %arg4[%223, %c0_83] : memref<64x128xf32, #tpu.memory_space<vmem>>, vector<1x128xf32>
    %225 = vector.shape_cast %224 : vector<1x128xf32> to vector<128xf32>
    %226 = arith.index_cast %219 : i32 to index
    %c0_84 = arith.constant 0 : index
    %227 = vector.load %arg8[%226, %c0_84] : memref<16x128xf32, #tpu.memory_space<vmem>>, vector<1x128xf32>
    %228 = vector.shape_cast %227 : vector<1x128xf32> to vector<128xf32>
    %229 = vector.shape_cast %225 : vector<128xf32> to vector<1x128xf32>
    tpu.vector_store %arg8[%226, %c0_84], %229 {strides = array<i32>} : memref<16x128xf32, #tpu.memory_space<vmem>>, vector<1x128xf32>,
    %c6_i32_85 = arith.constant 6 : i32
    %c0_i32_86 = arith.constant 0 : i32
    %230 = arith.addi %c0_i32_86, %c6_i32_85 : i32
    %231 = arith.addi %1, %230 : i32
    %232 = arith.index_cast %231 : i32 to index
    %233 = memref.load %arg2[%232] : memref<32xi32, #tpu.memory_space<smem>>
    %234 = arith.index_cast %233 : i32 to index
    %c0_87 = arith.constant 0 : index
    %235 = vector.load %arg4[%234, %c0_87] : memref<64x128xf32, #tpu.memory_space<vmem>>, vector<1x128xf32>
    %236 = vector.shape_cast %235 : vector<1x128xf32> to vector<128xf32>
    %237 = arith.index_cast %230 : i32 to index
    %c0_88 = arith.constant 0 : index
    %238 = vector.load %arg8[%237, %c0_88] : memref<16x128xf32, #tpu.memory_space<vmem>>, vector<1x128xf32>
    %239 = vector.shape_cast %238 : vector<1x128xf32> to vector<128xf32>
    %240 = vector.shape_cast %236 : vector<128xf32> to vector<1x128xf32>
    tpu.vector_store %arg8[%237, %c0_88], %240 {strides = array<i32>} : memref<16x128xf32, #tpu.memory_space<vmem>>, vector<1x128xf32>,
    %c7_i32_89 = arith.constant 7 : i32
    %c0_i32_90 = arith.constant 0 : i32
    %241 = arith.addi %c0_i32_90, %c7_i32_89 : i32
    %242 = arith.addi %1, %241 : i32
    %243 = arith.index_cast %242 : i32 to index
    %244 = memref.load %arg2[%243] : memref<32xi32, #tpu.memory_space<smem>>
    %245 = arith.index_cast %244 : i32 to index
    %c0_91 = arith.constant 0 : index
    %246 = vector.load %arg4[%245, %c0_91] : memref<64x128xf32, #tpu.memory_space<vmem>>, vector<1x128xf32>
    %247 = vector.shape_cast %246 : vector<1x128xf32> to vector<128xf32>
    %248 = arith.index_cast %241 : i32 to index
    %c0_92 = arith.constant 0 : index
    %249 = vector.load %arg8[%248, %c0_92] : memref<16x128xf32, #tpu.memory_space<vmem>>, vector<1x128xf32>
    %250 = vector.shape_cast %249 : vector<1x128xf32> to vector<128xf32>
    %251 = vector.shape_cast %247 : vector<128xf32> to vector<1x128xf32>
    tpu.vector_store %arg8[%248, %c0_92], %251 {strides = array<i32>} : memref<16x128xf32, #tpu.memory_space<vmem>>, vector<1x128xf32>,
    %c8_i32_93 = arith.constant 8 : i32
    %c0_i32_94 = arith.constant 0 : i32
    %c0_i32_95 = arith.constant 0 : i32
    %c0_i32_96 = arith.constant 0 : i32
    %252 = tpu.memref_slice %arg7[%c0_i32_95, %c0_i32_96] : memref<16x128xf32, #tpu.memory_space<vmem>> -> memref<8x128xf32, #tpu.memory_space<vmem>>
    %c0_i32_97 = arith.constant 0 : i32
    %c0_i32_98 = arith.constant 0 : i32
    %253 = tpu.memref_slice %arg7[%c0_i32_97, %c0_i32_98] : memref<16x128xf32, #tpu.memory_space<vmem>> -> memref<8x128xf32, #tpu.memory_space<vmem>>
    %254 = tpu.memref_slice %arg9[%c0_i32_94] : memref<2x!tpu.dma_semaphore, #tpu.memory_space<semaphore_mem>> -> memref<1x!tpu.dma_semaphore, #tpu.memory_space<semaphore_mem>>
    %255 = tpu.memref_squeeze %254 : memref<1x!tpu.dma_semaphore, #tpu.memory_space<semaphore_mem>> -> memref<!tpu.dma_semaphore, #tpu.memory_space<semaphore_mem>>
    tpu.wait_dma2 semaphore(%255 : memref<!tpu.dma_semaphore, #tpu.memory_space<semaphore_mem>>) src(%252 : memref<8x128xf32, #tpu.memory_space<vmem>>) dst(%253 : memref<8x128xf32, #tpu.memory_space<vmem>>)
    %c0_99 = arith.constant 0 : index
    %c0_100 = arith.constant 0 : index
    %256 = vector.load %arg7[%c0_99, %c0_100] : memref<16x128xf32, #tpu.memory_space<vmem>>, vector<8x128xf32>
    %c0_101 = arith.constant 0 : index
    %c0_102 = arith.constant 0 : index
    %257 = vector.load %arg8[%c0_101, %c0_102] : memref<16x128xf32, #tpu.memory_space<vmem>>, vector<8x128xf32>
    %258 = arith.addf %256, %257 : vector<8x128xf32>
    %cst = arith.constant dense<0.000000e+00> : vector<8xf32>
    %259 = vector.multi_reduction <add>, %258, %cst [1] : vector<8x128xf32> to vector<8xf32>
    %260 = vector.shape_cast %259 : vector<8xf32> to vector<8x1xf32>
    %cst_103 = arith.constant 7.812500e-03 : f32
    %261 = vector.broadcast %cst_103 : f32 to vector<8x1xf32>
    %262 = arith.mulf %260, %261 : vector<8x1xf32>
    %263 = arith.mulf %258, %258 : vector<8x128xf32>
    %cst_104 = arith.constant dense<0.000000e+00> : vector<8xf32>
    %264 = vector.multi_reduction <add>, %263, %cst_104 [1] : vector<8x128xf32> to vector<8xf32>
    %265 = vector.shape_cast %264 : vector<8xf32> to vector<8x1xf32>
    %cst_105 = arith.constant 7.812500e-03 : f32
    %266 = vector.broadcast %cst_105 : f32 to vector<8x1xf32>
    %267 = arith.mulf %265, %266 : vector<8x1xf32>
    %268 = arith.mulf %262, %262 : vector<8x1xf32>
    %269 = arith.subf %267, %268 : vector<8x1xf32>
    %270 = vector.broadcast %262 : vector<8x1xf32> to vector<8x128xf32>
    %271 = arith.subf %258, %270 : vector<8x128xf32>
    %cst_106 = arith.constant 9.99999974E-6 : f32
    %272 = vector.broadcast %cst_106 : f32 to vector<8x1xf32>
    %273 = arith.addf %269, %272 : vector<8x1xf32>
    %274 = math.rsqrt %273 : vector<8x1xf32>
    %275 = vector.broadcast %274 : vector<8x1xf32> to vector<8x128xf32>
    %276 = arith.mulf %271, %275 : vector<8x128xf32>
    %277 = vector.broadcast %2 : vector<1x128xf32> to vector<8x128xf32>
    %278 = arith.mulf %276, %277 : vector<8x128xf32>
    %279 = vector.broadcast %3 : vector<1x128xf32> to vector<8x128xf32>
    %280 = arith.addf %278, %279 : vector<8x128xf32>
    %c0_107 = arith.constant 0 : index
    %c0_108 = arith.constant 0 : index
    %281 = vector.load %arg6[%c0_107, %c0_108] : memref<16x128xf32, #tpu.memory_space<vmem>>, vector<8x128xf32>
    tpu.vector_store %arg6[%c0_107, %c0_108], %280 {strides = array<i32>} : memref<16x128xf32, #tpu.memory_space<vmem>>, vector<8x128xf32>,
    %c0_i32_109 = arith.constant 0 : i32
    %c8_i32_110 = arith.constant 8 : i32
    %282 = arith.addi %c8_i32_110, %c0_i32_109 : i32
    %283 = arith.addi %1, %282 : i32
    %284 = arith.index_cast %283 : i32 to index
    %285 = memref.load %arg2[%284] : memref<32xi32, #tpu.memory_space<smem>>
    %286 = arith.index_cast %285 : i32 to index
    %c0_111 = arith.constant 0 : index
    %287 = vector.load %arg4[%286, %c0_111] : memref<64x128xf32, #tpu.memory_space<vmem>>, vector<1x128xf32>
    %288 = vector.shape_cast %287 : vector<1x128xf32> to vector<128xf32>
    %289 = arith.index_cast %282 : i32 to index
    %c0_112 = arith.constant 0 : index
    %290 = vector.load %arg8[%289, %c0_112] : memref<16x128xf32, #tpu.memory_space<vmem>>, vector<1x128xf32>
    %291 = vector.shape_cast %290 : vector<1x128xf32> to vector<128xf32>
    %292 = vector.shape_cast %288 : vector<128xf32> to vector<1x128xf32>
    tpu.vector_store %arg8[%289, %c0_112], %292 {strides = array<i32>} : memref<16x128xf32, #tpu.memory_space<vmem>>, vector<1x128xf32>,
    %c1_i32_113 = arith.constant 1 : i32
    %c8_i32_114 = arith.constant 8 : i32
    %293 = arith.addi %c8_i32_114, %c1_i32_113 : i32
    %294 = arith.addi %1, %293 : i32
    %295 = arith.index_cast %294 : i32 to index
    %296 = memref.load %arg2[%295] : memref<32xi32, #tpu.memory_space<smem>>
    %297 = arith.index_cast %296 : i32 to index
    %c0_115 = arith.constant 0 : index
    %298 = vector.load %arg4[%297, %c0_115] : memref<64x128xf32, #tpu.memory_space<vmem>>, vector<1x128xf32>
    %299 = vector.shape_cast %298 : vector<1x128xf32> to vector<128xf32>
    %300 = arith.index_cast %293 : i32 to index
    %c0_116 = arith.constant 0 : index
    %301 = vector.load %arg8[%300, %c0_116] : memref<16x128xf32, #tpu.memory_space<vmem>>, vector<1x128xf32>
    %302 = vector.shape_cast %301 : vector<1x128xf32> to vector<128xf32>
    %303 = vector.shape_cast %299 : vector<128xf32> to vector<1x128xf32>
    tpu.vector_store %arg8[%300, %c0_116], %303 {strides = array<i32>} : memref<16x128xf32, #tpu.memory_space<vmem>>, vector<1x128xf32>,
    %c2_i32_117 = arith.constant 2 : i32
    %c8_i32_118 = arith.constant 8 : i32
    %304 = arith.addi %c8_i32_118, %c2_i32_117 : i32
    %305 = arith.addi %1, %304 : i32
    %306 = arith.index_cast %305 : i32 to index
    %307 = memref.load %arg2[%306] : memref<32xi32, #tpu.memory_space<smem>>
    %308 = arith.index_cast %307 : i32 to index
    %c0_119 = arith.constant 0 : index
    %309 = vector.load %arg4[%308, %c0_119] : memref<64x128xf32, #tpu.memory_space<vmem>>, vector<1x128xf32>
    %310 = vector.shape_cast %309 : vector<1x128xf32> to vector<128xf32>
    %311 = arith.index_cast %304 : i32 to index
    %c0_120 = arith.constant 0 : index
    %312 = vector.load %arg8[%311, %c0_120] : memref<16x128xf32, #tpu.memory_space<vmem>>, vector<1x128xf32>
    %313 = vector.shape_cast %312 : vector<1x128xf32> to vector<128xf32>
    %314 = vector.shape_cast %310 : vector<128xf32> to vector<1x128xf32>
    tpu.vector_store %arg8[%311, %c0_120], %314 {strides = array<i32>} : memref<16x128xf32, #tpu.memory_space<vmem>>, vector<1x128xf32>,
    %c3_i32_121 = arith.constant 3 : i32
    %c8_i32_122 = arith.constant 8 : i32
    %315 = arith.addi %c8_i32_122, %c3_i32_121 : i32
    %316 = arith.addi %1, %315 : i32
    %317 = arith.index_cast %316 : i32 to index
    %318 = memref.load %arg2[%317] : memref<32xi32, #tpu.memory_space<smem>>
    %319 = arith.index_cast %318 : i32 to index
    %c0_123 = arith.constant 0 : index
    %320 = vector.load %arg4[%319, %c0_123] : memref<64x128xf32, #tpu.memory_space<vmem>>, vector<1x128xf32>
    %321 = vector.shape_cast %320 : vector<1x128xf32> to vector<128xf32>
    %322 = arith.index_cast %315 : i32 to index
    %c0_124 = arith.constant 0 : index
    %323 = vector.load %arg8[%322, %c0_124] : memref<16x128xf32, #tpu.memory_space<vmem>>, vector<1x128xf32>
    %324 = vector.shape_cast %323 : vector<1x128xf32> to vector<128xf32>
    %325 = vector.shape_cast %321 : vector<128xf32> to vector<1x128xf32>
    tpu.vector_store %arg8[%322, %c0_124], %325 {strides = array<i32>} : memref<16x128xf32, #tpu.memory_space<vmem>>, vector<1x128xf32>,
    %c4_i32_125 = arith.constant 4 : i32
    %c8_i32_126 = arith.constant 8 : i32
    %326 = arith.addi %c8_i32_126, %c4_i32_125 : i32
    %327 = arith.addi %1, %326 : i32
    %328 = arith.index_cast %327 : i32 to index
    %329 = memref.load %arg2[%328] : memref<32xi32, #tpu.memory_space<smem>>
    %330 = arith.index_cast %329 : i32 to index
    %c0_127 = arith.constant 0 : index
    %331 = vector.load %arg4[%330, %c0_127] : memref<64x128xf32, #tpu.memory_space<vmem>>, vector<1x128xf32>
    %332 = vector.shape_cast %331 : vector<1x128xf32> to vector<128xf32>
    %333 = arith.index_cast %326 : i32 to index
    %c0_128 = arith.constant 0 : index
    %334 = vector.load %arg8[%333, %c0_128] : memref<16x128xf32, #tpu.memory_space<vmem>>, vector<1x128xf32>
    %335 = vector.shape_cast %334 : vector<1x128xf32> to vector<128xf32>
    %336 = vector.shape_cast %332 : vector<128xf32> to vector<1x128xf32>
    tpu.vector_store %arg8[%333, %c0_128], %336 {strides = array<i32>} : memref<16x128xf32, #tpu.memory_space<vmem>>, vector<1x128xf32>,
    %c5_i32_129 = arith.constant 5 : i32
    %c8_i32_130 = arith.constant 8 : i32
    %337 = arith.addi %c8_i32_130, %c5_i32_129 : i32
    %338 = arith.addi %1, %337 : i32
    %339 = arith.index_cast %338 : i32 to index
    %340 = memref.load %arg2[%339] : memref<32xi32, #tpu.memory_space<smem>>
    %341 = arith.index_cast %340 : i32 to index
    %c0_131 = arith.constant 0 : index
    %342 = vector.load %arg4[%341, %c0_131] : memref<64x128xf32, #tpu.memory_space<vmem>>, vector<1x128xf32>
    %343 = vector.shape_cast %342 : vector<1x128xf32> to vector<128xf32>
    %344 = arith.index_cast %337 : i32 to index
    %c0_132 = arith.constant 0 : index
    %345 = vector.load %arg8[%344, %c0_132] : memref<16x128xf32, #tpu.memory_space<vmem>>, vector<1x128xf32>
    %346 = vector.shape_cast %345 : vector<1x128xf32> to vector<128xf32>
    %347 = vector.shape_cast %343 : vector<128xf32> to vector<1x128xf32>
    tpu.vector_store %arg8[%344, %c0_132], %347 {strides = array<i32>} : memref<16x128xf32, #tpu.memory_space<vmem>>, vector<1x128xf32>,
    %c6_i32_133 = arith.constant 6 : i32
    %c8_i32_134 = arith.constant 8 : i32
    %348 = arith.addi %c8_i32_134, %c6_i32_133 : i32
    %349 = arith.addi %1, %348 : i32
    %350 = arith.index_cast %349 : i32 to index
    %351 = memref.load %arg2[%350] : memref<32xi32, #tpu.memory_space<smem>>
    %352 = arith.index_cast %351 : i32 to index
    %c0_135 = arith.constant 0 : index
    %353 = vector.load %arg4[%352, %c0_135] : memref<64x128xf32, #tpu.memory_space<vmem>>, vector<1x128xf32>
    %354 = vector.shape_cast %353 : vector<1x128xf32> to vector<128xf32>
    %355 = arith.index_cast %348 : i32 to index
    %c0_136 = arith.constant 0 : index
    %356 = vector.load %arg8[%355, %c0_136] : memref<16x128xf32, #tpu.memory_space<vmem>>, vector<1x128xf32>
    %357 = vector.shape_cast %356 : vector<1x128xf32> to vector<128xf32>
    %358 = vector.shape_cast %354 : vector<128xf32> to vector<1x128xf32>
    tpu.vector_store %arg8[%355, %c0_136], %358 {strides = array<i32>} : memref<16x128xf32, #tpu.memory_space<vmem>>, vector<1x128xf32>,
    %c7_i32_137 = arith.constant 7 : i32
    %c8_i32_138 = arith.constant 8 : i32
    %359 = arith.addi %c8_i32_138, %c7_i32_137 : i32
    %360 = arith.addi %1, %359 : i32
    %361 = arith.index_cast %360 : i32 to index
    %362 = memref.load %arg2[%361] : memref<32xi32, #tpu.memory_space<smem>>
    %363 = arith.index_cast %362 : i32 to index
    %c0_139 = arith.constant 0 : index
    %364 = vector.load %arg4[%363, %c0_139] : memref<64x128xf32, #tpu.memory_space<vmem>>, vector<1x128xf32>
    %365 = vector.shape_cast %364 : vector<1x128xf32> to vector<128xf32>
    %366 = arith.index_cast %359 : i32 to index
    %c0_140 = arith.constant 0 : index
    %367 = vector.load %arg8[%366, %c0_140] : memref<16x128xf32, #tpu.memory_space<vmem>>, vector<1x128xf32>
    %368 = vector.shape_cast %367 : vector<1x128xf32> to vector<128xf32>
    %369 = vector.shape_cast %365 : vector<128xf32> to vector<1x128xf32>
    tpu.vector_store %arg8[%366, %c0_140], %369 {strides = array<i32>} : memref<16x128xf32, #tpu.memory_space<vmem>>, vector<1x128xf32>,
    %c8_i32_141 = arith.constant 8 : i32
    %c1_i32_142 = arith.constant 1 : i32
    %c8_i32_143 = arith.constant 8 : i32
    %c0_i32_144 = arith.constant 0 : i32
    %370 = tpu.memref_slice %arg7[%c8_i32_143, %c0_i32_144] : memref<16x128xf32, #tpu.memory_space<vmem>> -> memref<8x128xf32, #tpu.memory_space<vmem>>
    %c8_i32_145 = arith.constant 8 : i32
    %c0_i32_146 = arith.constant 0 : i32
    %371 = tpu.memref_slice %arg7[%c8_i32_145, %c0_i32_146] : memref<16x128xf32, #tpu.memory_space<vmem>> -> memref<8x128xf32, #tpu.memory_space<vmem>>
    %372 = tpu.memref_slice %arg9[%c1_i32_142] : memref<2x!tpu.dma_semaphore, #tpu.memory_space<semaphore_mem>> -> memref<1x!tpu.dma_semaphore, #tpu.memory_space<semaphore_mem>>
    %373 = tpu.memref_squeeze %372 : memref<1x!tpu.dma_semaphore, #tpu.memory_space<semaphore_mem>> -> memref<!tpu.dma_semaphore, #tpu.memory_space<semaphore_mem>>
    tpu.wait_dma2 semaphore(%373 : memref<!tpu.dma_semaphore, #tpu.memory_space<semaphore_mem>>) src(%370 : memref<8x128xf32, #tpu.memory_space<vmem>>) dst(%371 : memref<8x128xf32, #tpu.memory_space<vmem>>)
    %c8 = arith.constant 8 : index
    %c0_147 = arith.constant 0 : index
    %374 = vector.load %arg7[%c8, %c0_147] : memref<16x128xf32, #tpu.memory_space<vmem>>, vector<8x128xf32>
    %c8_148 = arith.constant 8 : index
    %c0_149 = arith.constant 0 : index
    %375 = vector.load %arg8[%c8_148, %c0_149] : memref<16x128xf32, #tpu.memory_space<vmem>>, vector<8x128xf32>
    %376 = arith.addf %374, %375 : vector<8x128xf32>
    %cst_150 = arith.constant dense<0.000000e+00> : vector<8xf32>
    %377 = vector.multi_reduction <add>, %376, %cst_150 [1] : vector<8x128xf32> to vector<8xf32>
    %378 = vector.shape_cast %377 : vector<8xf32> to vector<8x1xf32>
    %cst_151 = arith.constant 7.812500e-03 : f32
    %379 = vector.broadcast %cst_151 : f32 to vector<8x1xf32>
    %380 = arith.mulf %378, %379 : vector<8x1xf32>
    %381 = arith.mulf %376, %376 : vector<8x128xf32>
    %cst_152 = arith.constant dense<0.000000e+00> : vector<8xf32>
    %382 = vector.multi_reduction <add>, %381, %cst_152 [1] : vector<8x128xf32> to vector<8xf32>
    %383 = vector.shape_cast %382 : vector<8xf32> to vector<8x1xf32>
    %cst_153 = arith.constant 7.812500e-03 : f32
    %384 = vector.broadcast %cst_153 : f32 to vector<8x1xf32>
    %385 = arith.mulf %383, %384 : vector<8x1xf32>
    %386 = arith.mulf %380, %380 : vector<8x1xf32>
    %387 = arith.subf %385, %386 : vector<8x1xf32>
    %388 = vector.broadcast %380 : vector<8x1xf32> to vector<8x128xf32>
    %389 = arith.subf %376, %388 : vector<8x128xf32>
    %cst_154 = arith.constant 9.99999974E-6 : f32
    %390 = vector.broadcast %cst_154 : f32 to vector<8x1xf32>
    %391 = arith.addf %387, %390 : vector<8x1xf32>
    %392 = math.rsqrt %391 : vector<8x1xf32>
    %393 = vector.broadcast %392 : vector<8x1xf32> to vector<8x128xf32>
    %394 = arith.mulf %389, %393 : vector<8x128xf32>
    %395 = vector.broadcast %2 : vector<1x128xf32> to vector<8x128xf32>
    %396 = arith.mulf %394, %395 : vector<8x128xf32>
    %397 = vector.broadcast %3 : vector<1x128xf32> to vector<8x128xf32>
    %398 = arith.addf %396, %397 : vector<8x128xf32>
    %c8_155 = arith.constant 8 : index
    %c0_156 = arith.constant 0 : index
    %399 = vector.load %arg6[%c8_155, %c0_156] : memref<16x128xf32, #tpu.memory_space<vmem>>, vector<8x128xf32>
    tpu.vector_store %arg6[%c8_155, %c0_156], %398 {strides = array<i32>} : memref<16x128xf32, #tpu.memory_space<vmem>>, vector<8x128xf32>,
    return
  }
  func.func @transform_1(%arg0: i32, %arg1: memref<32xi32, #tpu.memory_space<smem>>, %arg2: memref<32xi32, #tpu.memory_space<smem>>) -> (i32, i32) {
    %c0_i32 = arith.constant 0 : i32
    %c0_i32_0 = arith.constant 0 : i32
    %c0_i32_1 = arith.constant 0 : i32
    return %c0_i32, %c0_i32_0 : i32, i32
  }
  func.func @transform_2(%arg0: i32, %arg1: memref<32xi32, #tpu.memory_space<smem>>, %arg2: memref<32xi32, #tpu.memory_space<smem>>) -> (i32, i32) {
    %c0_i32 = arith.constant 0 : i32
    %c0_i32_0 = arith.constant 0 : i32
    %c0_i32_1 = arith.constant 0 : i32
    return %c0_i32, %c0_i32_0 : i32, i32
  }
  func.func @transform_3(%arg0: i32, %arg1: memref<32xi32, #tpu.memory_space<smem>>, %arg2: memref<32xi32, #tpu.memory_space<smem>>) -> (i32, i32) {
    %c0_i32 = arith.constant 0 : i32
    %c0_i32_0 = arith.constant 0 : i32
    return %arg0, %c0_i32 : i32, i32
  }
}

</mosaic_0001>

<bundles_post_ra>
// kernel: tpu_custom_call.1
= control target key start
LH: loop header
LB: loop body
LE: loop exit
PB: predicated region body
PF: predicated region fallthrough
CT: control target
= control target key end

     0   :  { %s1871_s0 = inlined_call_operand.hbm [shape: s32[32], index: 0, kind: input, shape index: {}]   ;;  %s1872_s2 = inlined_call_operand.hbm [shape: f32[100,128], index: 2, kind: input, shape index: {}]   ;;  %s1873_s3 = inlined_call_operand.hbm [shape: f32[64,128], index: 3, kind: input, shape index: {}]   ;;  %s1874_s4 = inlined_call_operand.vmem [shape: f32[2,128], index: 4, kind: input, shape index: {}]   ;;  %s1875_s5 = inlined_call_operand.hbm [shape: f32[32,128], index: 5, kind: output, shape index: {}]   ;;  %s1876_s1 = inlined_call_operand.vmem [shape: s32[32], index: 1, kind: input, shape index: {}]  }
   0x1   :  { %1901 = sst [smem:[#allocation56_spill]] %s1873_s3  ;;  %s768_s20 = scalar_lea.hbm %s1871_s0, 16 }
   0x2   :  { %1902 = sst [smem:[#allocation57_spill]] %s1874_s4  ;;  %p769_p0 = scmp.ne.s32.totalorder %s1871_s0, %s768_s20 }
   0x3   :  { %p772_p1 = scmp.lt.u32.totalorder %s768_s20, %s1871_s0 }
   0x5   :  { %p774_p2 = pnand %p772_p1, %p769_p0 }
   0x7   :  { %777 = shalt.err (!%p774_p2)  }
   0x8   :  { %s1276_s25 = smov [#allocation6]   ;;  %s12_s30 = sshll.u32 %s1876_s1, 4  ;;  %s13_s30 = int_to_ptr.vmem [resolvable:$true] %s12_s30 }
   0x9   :  { %11 = dma.hbm_to_smem %s1871_s0, 16, %s1276_s25, [#allocation5] }
   0xa   :  { %s778_s6 = scalar_lea.vmem %s13_s30, 16  ;;  %p783_p4 = scmp.lt.s32.totalorder %s13_s30, %s13_s30 }
   0xb   :  { %p779_p3 = scmp.ne.s32.totalorder %s13_s30, %s778_s6  ;;  %p784_p5 = scmp.lt.s32.totalorder %s778_s6, %s778_s6 }
   0xd   :  { %p785_p6 = por %p784_p5, %p783_p4 }
   0xf   :  { %p786_p7 = pnand %p785_p6, %p779_p3 }
  0x11   :  { %789 = shalt.err (!%p786_p7)  }
  0x12   :  { %s1277_s7 = smov [#allocation7]  }
  0x13   :  { %15 = dma.vmem_to_smem %s13_s30, 16, %s1277_s7, [#allocation5] }
  0x14   :  { %1246 = dma.done.wait [#allocation5], 32 }
  0x15   :  { %1247 = vsyncadd [#allocation5], 4294967264 }
  0x16   :  { %17 = sfence }
  0x17   :  { %18 = vsyncpa [#allocation9], 0 }
  0x18   :  { %19 = vsyncpa [#allocation10], 0 }
  0x19   :  { %21 = vsyncpa [#allocation10 + $0x1], 0  ;;  %s1345_s0 = smov 0   ;;  %s1347_s8 = smov 0  }
  0x1a   :  { %s1349_s1 = smov 0   ;;  %s1351_s9 = smov 0  }
  0x1b LB: > { %1903 = sst [smem:[#allocation51_spill]] %s1262_s0  ;;  %s1366_s10 = sadd.s32 4294967295, %s1274_s9   ;;  %s1274_s9 = sphi %s1351_s9, %s1937_s9   ;;  %s1270_s1 = sphi %s1349_s1, %s1939_s1   ;;  %s1266_s8 = sphi %s1347_s8, %s1941_s8   ;;  %s1262_s0 = sphi %s1345_s0, %s1940_s0  }
  0x1c   : > { %1904 = sst [smem:[#allocation52_spill]] %s1270_s1  ;;  %s659_s11 = sadd.s32 4294967294, %s1274_s9  }
  0x1d   : > { %s1370_s12 = sadd.s32 1, %s1274_s9   ;;  %s76_s13 = sadd.s32 1, %s1270_s1 }
  0x1e   : > { %1905 = sst [smem:[#allocation53_spill]] %s1370_s12  ;;  %s73_s14 = ssub.s32 %s1274_s9, %s1370_s12 }
  0x1f   : > { %p86_p8 = scmp.ne.s32.totalorder %s1270_s1, %s1266_s8  ;;  %p74_p9 = scmp.eq.s32.totalorder %s73_s14, 0 }
  0x20   : > { %p87_p10 = scmp.eq.s32.totalorder %s1366_s10, 1  ;;  %p92_p11 = scmp.ne.s32.totalorder %s1266_s8, %s1262_s0 }
  0x21   : > { %p93_p12 = scmp.eq.s32.totalorder %s659_s11, 1  ;;  %p660_p1 = scmp.ge.s32.totalorder %s1274_s9, 1 }
  0x22   : > { %s1381_s15 = scalar_select %p74_p9, %s1270_s1, %s76_s13  }
  0x23   : > { %p1383_p13 = por %p87_p10, %p86_p8  ;;  %p1387_p0 = por %p93_p12, %p92_p11 }
  0x24   : > { %1906 = sst [smem:[#allocation54_spill]] %s1381_s15  ;;  %p100_p2 = scmp.lt.s32.totalorder %s1274_s9, 3 }
  0x25   : > { %s1907_s16 = scalar_select %p1383_p13, 1, 0 }
  0x26   : > { %s1908_s17 = scalar_select %p1387_p0, 1, 0 }
  0x27   : > { %p1877_p3 = scmp.eq.s32.totalorder %s1366_s10, 0  ;;  %p1394_p4 = pnand %p660_p1, %p100_p2 }
  0x28   : > { %1909 = sst [smem:[#allocation55_spill]] %s1908_s17  ;;  %s1278_s19 = smov [#allocation8]  }
  0x29   : > { %s1910_s18 = scalar_select %p1394_p4, 1, 0 }
  0x2a   : > { %s112_s20 = sshll.u32 %s1278_s19, 4  ;;  %p698_p5 = pneg %p1394_p4  ;;  %s113_s20 = int_to_ptr.vmem [resolvable:$true] %s112_s20 }
  0x2b   : > { %s1912_s3 = sld [smem:[#allocation56_spill]] }
  0x2c   : > { %p1402_p6 = pnand %p1877_p3, %p698_p5 }
  0x2e   : > { %p792_p8 = pneg %p1402_p6 }
  0x31   : > { %s790_s24 = scalar_lea.hbm %s1912_s3, 1024 }
  0x32   : > { %p791_p7 = scmp.ne.s32.totalorder %s1912_s3, %s790_s24  ;;  %p797_p11 = scmp.lt.u32.totalorder %s790_s24, %s1912_s3 }
  0x34   : > { %p793_p9 = pnand %p792_p8, %p791_p7 }
  0x36   : > { %p794_p10 = pneg %p793_p9 }
  0x38   : > { %p799_p12 = pnand %p797_p11, %p794_p10 }
  0x3a   : > { %802 = shalt.err (!%p799_p12)
}
  0x3b   : > { %s803_s29 = scalar_lea.vmem %s113_s20, 1024  ;;  %p811_p3 = scmp.lt.s32.totalorder %s113_s20, %s113_s20 }
  0x3c   : > { %p804_p1 = scmp.ne.s32.totalorder %s113_s20, %s803_s29  ;;  %p812_p0 = scmp.lt.s32.totalorder %s803_s29, %s803_s29 }
  0x3e   : > { %p806_p2 = pnand %p804_p1, %p792_p8  ;;  %p813_p13 = por %p812_p0, %p811_p3 }
  0x40   : > { %p807_p5 = pneg %p806_p2 }
  0x42   : > { %p814_p4 = pnand %p813_p13, %p807_p5 }
  0x44   : > { %817 = shalt.err (!%p814_p4)
}
  0x45   : > { %s1279_s30 = smov 128   ;;  %s1280_s6 = smov 8  }
  0x46   : > { %701 = dma.hbm_to_vmem [thread:$0]  (!%p1402_p6), %s1912_s3, 1024, %s113_s20, [#allocation9], %s1279_s30, %s1279_s30, %s1280_s6  }
  0x47   : > { %p1913_p7 = scmp.ne.s32.totalorder %s1910_s18, 0 }
  0x48   : > { %p1914_p9 = scmp.eq.s32.totalorder (!%p1913_p7), %s1366_s10, 0 }
  0x49   : > { %131 = sbr.rel (%p1913_p7) target bundleno = 825 (0x339), region = 28 }
  0x50   : > { %1249 = dma.done.wait (%p1914_p9), [#allocation9], 1024   ;;  %p1915_p8 = pmov %p1914_p9 }
  0x51   : > { %s1880_s13 = sand.u32 1, %s1266_s8   ;;  %s1430_s14 = sshll.u32 %s1366_s10, 4 }
  0x52   : > { %1251 = vsyncadd (%p1915_p8), [#allocation9], 4294966272  ;;  %s1434_s18 = sshll.u32 %s1880_s13, 4  ;;  %s152_s19 = sld [smem:[#allocation6 + %s1430_s14]] }
  0x53   : > { %s1281_s20 = smov [#allocation2]   ;;  %s1882_s22 = sadd.s32 1, %s1430_s14 }
  0x54   : > { %s162_s21 = sshll.u32 %s1281_s20, 4  ;;  %s1442_s23 = sld [smem:[#allocation6 + %s1882_s22]]  ;;  %s1438_s21 = int_to_ptr.vmem [resolvable:$true] %s162_s21 }
  0x55   : > { %s1881_s24 = sadd.s32 2, %s1430_s14  ;;  %s1282_s25 = smov [#allocation2 + $0x1]  }
  0x56   : > { %s178_s26 = sshll.u32 %s1282_s25, 4  ;;  %s1447_s27 = sld [smem:[#allocation6 + %s1881_s24]]  ;;  %s1459_s26 = int_to_ptr.vmem [resolvable:$true] %s178_s26 }
  0x57   : > { %s1916_s4 = sld [smem:[#allocation57_spill]]  ;;  %s1467_s28 = scalar_lea.hbm %s1872_s2, 1664 }
  0x58   : > { %s666_s7 = sshll.u32 %s152_s19, 4 }
  0x59   : > { %s154_s25 = scalar_lea.hbm %s1872_s2, %s666_s7 }
  0x5a   : > { %s818_s13 = scalar_lea.hbm %s154_s25, 16  ;;  %p821_p0 = scmp.lt.u32.totalorder %s154_s25, %s1872_s2 }
  0x5b   : > { %p819_p13 = scmp.ne.s32.totalorder %s154_s25, %s818_s13  ;;  %p822_p3 = scmp.lt.u32.totalorder %s1467_s28, %s818_s13 }
  0x5c   : > { %p824_p6 = scmp.lt.u32.totalorder %s818_s13, %s154_s25 }
  0x5d   : > { %v1452_v0 = vld [vmem:[%s1916_s4] ss:$0 sm:$0xff]  ;;  %v1457_v1 = vld [vmem:[%s1916_s4 + $0x1] ss:$0 sm:$0xff]  ;;  %p823_p4 = por %p822_p3, %p821_p0 }
  0x5f   : > { %p825_p10 = por %p824_p6, %p823_p4 }
  0x61   : > { %p826_p11 = pnand %p825_p10, %p819_p13 }
  0x63   : > { %829 = shalt.err (!%p826_p11)  }
  0x64   : > { %s830_s19 = scalar_lea.vmem %s1438_s21, 16  ;;  %s1476_s22 = scalar_lea.vmem %s1438_s21, 256 }
  0x65   : > { %p831_p12 = scmp.ne.s32.totalorder %s1438_s21, %s830_s19  ;;  %p835_p1 = scmp.lt.s32.totalorder %s1438_s21, %s1438_s21 }
  0x66   : > { %p836_p2 = scmp.lt.s32.totalorder %s1476_s22, %s830_s19 }
  0x68   : > { %p837_p5 = por %p836_p2, %p835_p1 }
  0x6a   : > { %p838_p7 = pnand %p837_p5, %p831_p12 }
  0x6c   : > { %841 = shalt.err (!%p838_p7)  }
  0x6d   : > { %165 = dma.hbm_to_vmem [thread:$0]  %s154_s25, 16, %s1438_s21, [#allocation4] }
  0x6e   : > { %s667_s3 = sshll.u32 %s1442_s23, 4  ;;  %s1283_s13 = smov [#allocation2 + $0x2]  }
  0x6f   : > { %s194_s24 = sshll.u32 %s1283_s13, 4  ;;  %s169_s7 = scalar_lea.hbm %s1872_s2, %s667_s3  ;;  %s1486_s24 = int_to_ptr.vmem [resolvable:$true] %s194_s24 }
  0x70   : > { %s842_s11 = scalar_lea.hbm %s169_s7, 16  ;;  %p845_p8 = scmp.lt.u32.totalorder %s169_s7, %s1872_s2 }
  0x71   : > { %p843_p9 = scmp.ne.s32.totalorder %s169_s7, %s842_s11  ;;  %p846_p13 = scmp.lt.u32.totalorder %s1467_s28, %s842_s11 }
  0x72   : > { %p848_p3 = scmp.lt.u32.totalorder %s842_s11, %s169_s7 }
  0x73   : > { %p847_p0 = por %p846_p13, %p845_p8 }
  0x75   : > { %p849_p4 = por %p848_p3, %p847_p0 }
  0x77   : > { %p850_p6 = pnand %p849_p4, %p843_p9 }
  0x79   : > { %853 = shalt.err (!%p850_p6)  }
  0x7a   : > { %s854_s23 = scalar_lea.vmem %s1459_s26, 16  ;;  %p859_p11 = scmp.lt.s32.totalorder %s1459_s26, %s1438_s21 }
  0x7b   : > { %p855_p10 = scmp.ne.s32.totalorder %s1459_s26, %s854_s23  ;;  %p860_p12 = scmp.lt.s32.totalorder %s1476_s22, %s854_s23 }
  0x7d   : > { %p861_p1 = por %p860_p12, %p859_p11 }
  0x7f   : > { %p862_p2 = pnand %p861_p1, %p855_p10 }
  0x81   : > { %865 = shalt.err (!%p862_p2)  }
  0x82   : > { %181 = dma.hbm_to_vmem [thread:$0]  %s169_s7, 16, %s1459_s26, [#allocation4] }
  0x83   : > { %s668_s25 = sshll.u32 %s1447_s27, 4  ;;  %s1883_s19 = sadd.s32 3, %s1430_s14 }
  0x84   : > { %s185_s30 = scalar_lea.hbm %s1872_s2, %s668_s25  ;;  %s1505_s6 = sld [smem:[#allocation6 + %s1883_s19]] }
  0x85   : > { %s866_s11 = scalar_lea.hbm %s185_s30, 16  ;;  %p869_p7 = scmp.lt.u32.totalorder %s185_s30, %s1872_s2 }
  0x86   : > { %p867_p5 = scmp.ne.s32.totalorder %s185_s30, %s866_s11  ;;  %p870_p9 = scmp.lt.u32.totalorder %s1467_s28, %s866_s11 }
  0x87   : > { %p872_p13 = scmp.lt.u32.totalorder %s866_s11, %s185_s30 }
  0x88   : > { %p871_p8 = por %p870_p9, %p869_p7 }
  0x8a   : > { %p873_p0 = por %p872_p13, %p871_p8 }
  0x8c   : > { %p874_p3 = pnand %p873_p0, %p867_p5 }
  0x8e   : > { %877 = shalt.err (!%p874_p3)  }
  0x8f   : > { %s878_s26 = scalar_lea.vmem %s1486_s24, 16  ;;  %p883_p6 = scmp.lt.s32.totalorder %s1486_s24, %s1438_s21 }
  0x90   : > { %p879_p4 = scmp.ne.s32.totalorder %s1486_s24, %s878_s26  ;;  %p884_p10 = scmp.lt.s32.totalorder %s1476_s22, %s878_s26 }
  0x92   : > { %p885_p11 = por %p884_p10, %p883_p6 }
  0x94   : > { %p886_p12 = pnand %p885_p11, %p879_p4 }
  0x96   : > { %889 = shalt.err (!%p886_p12)  }
  0x97   : > { %197 = dma.hbm_to_vmem [thread:$0]  %s185_s30, 16, %s1486_s24, [#allocation4] }
  0x98   : > { %s1885_s27 = sadd.s32 4, %s1430_s14  ;;  %s1284_s7 = smov [#allocation2 + $0x3]  }
  0x99   : > { %s210_s23 = sshll.u32 %s1284_s7, 4  ;;  %s215_s25 = sld [smem:[#allocation6 + %s1885_s27]]  ;;  %s211_s23 = int_to_ptr.vmem [resolvable:$true] %s210_s23 }
  0x9a   : > { %s1285_s3 = smov [#allocation2 + $0x4]   ;;  %s1884_s11 = sadd.s32 5, %s1430_s14 }
  0x9b   : > { %s226_s13 = sshll.u32 %s1285_s3, 4  ;;  %s669_s20 = sshll.u32 %s1505_s6, 4  ;;  %s1522_s13 = int_to_ptr.vmem [resolvable:$true] %s226_s13 }
  0x9c   : > { %s201_s19 = scalar_lea.hbm %s1872_s2, %s669_s20  ;;  %s1529_s4 = sld [smem:[#allocation6 + %s1884_s11]] }
  0x9d   : > { %s890_s24 = scalar_lea.hbm %s201_s19, 16  ;;  %p893_p2 = scmp.lt.u32.totalorder %s201_s19, %s1872_s2 }
  0x9e   : > { %p891_p1 = scmp.ne.s32.totalorder %s201_s19, %s890_s24  ;;  %p894_p5 = scmp.lt.u32.totalorder %s1467_s28, %s890_s24 }
  0x9f   : > { %p896_p9 = scmp.lt.u32.totalorder %s890_s24, %s201_s19 }
  0xa0   : > { %p895_p7 = por %p894_p5, %p893_p2 }
  0xa2   : > { %p897_p8 = por %p896_p9, %p895_p7 }
  0xa4   : > { %p898_p13 = pnand %p897_p8, %p891_p1 }
  0xa6   : > { %901 = shalt.err (!%p898_p13)  }
  0xa7   : > { %s902_s6 = scalar_lea.vmem %s211_s23, 16  ;;  %p907_p3 = scmp.lt.s32.totalorder %s211_s23, %s1438_s21 }
  0xa8   : > { %p903_p0 = scmp.ne.s32.totalorder %s211_s23, %s902_s6  ;;  %p908_p4 = scmp.lt.s32.totalorder %s1476_s22, %s902_s6 }
  0xaa   : > { %p909_p6 = por %p908_p4, %p907_p3 }
  0xac   : > { %p910_p10 = pnand %p909_p6, %p903_p0 }
  0xae   : > { %913 = shalt.err (!%p910_p10)  }
  0xaf   : > { %213 = dma.hbm_to_vmem [thread:$0]  %s201_s19, 16, %s211_s23, [#allocation4] }
  0xb0   : > { %s670_s3 = sshll.u32 %s215_s25, 4  ;;  %s1286_s24 = smov [#allocation2 + $0x5]  }
  0xb1   : > { %s217_s26 = scalar_lea.hbm %s1872_s2, %s670_s3  ;;  %s242_s30 = sshll.u32 %s1286_s24, 4  ;;  %s243_s30 = int_to_ptr.vmem [resolvable:$true] %s242_s30 }
  0xb2   : > { %s914_s7 = scalar_lea.hbm %s217_s26, 16  ;;  %p917_p12 = scmp.lt.u32.totalorder %s217_s26, %s1872_s2 }
  0xb3   : > { %p915_p11 = scmp.ne.s32.totalorder %s217_s26, %s914_s7  ;;  %p918_p1 = scmp.lt.u32.totalorder %s1467_s28, %s914_s7 }
  0xb4   : > { %p920_p5 = scmp.lt.u32.totalorder %s914_s7, %s217_s26 }
  0xb5   : > { %p919_p2 = por %p918_p1, %p917_p12 }
  0xb7   : > { %p921_p7 = por %p920_p5, %p919_p2 }
  0xb9   : > { %p922_p9 = pnand %p921_p7, %p915_p11 }
  0xbb   : > { %925 = shalt.err (!%p922_p9)  }
  0xbc   : > { %s926_s19 = scalar_lea.vmem %s1522_s13, 16  ;;  %p931_p13 = scmp.lt.s32.totalorder %s1522_s13, %s1438_s21 }
  0xbd   : > { %p927_p8 = scmp.ne.s32.totalorder %s1522_s13, %s926_s19  ;;  %p932_p0 = scmp.lt.s32.totalorder %s1476_s22, %s926_s19 }
  0xbf   : > { %p933_p3 = por %p932_p0, %p931_p13 }
  0xc1   : > { %p934_p4 = pnand %p933_p3, %p927_p8 }
  0xc3   : > { %937 = shalt.err (!%p934_p4)  }
  0xc4   : > { %229 = dma.hbm_to_vmem [thread:$0]  %s217_s26, 16, %s1522_s13, [#allocation4] }
  0xc5   : > { %s1886_s27 = sadd.s32 6, %s1430_s14  ;;  %s671_s23 = sshll.u32 %s1529_s4, 4 }
  0xc6   : > { %s1554_s25 = sld [smem:[#allocation6 + %s1886_s27]]  ;;  %s233_s3 = scalar_lea.hbm %s1872_s2, %s671_s23 }
  0xc7   : > { %s938_s20 = scalar_lea.hbm %s233_s3, 16  ;;  %p941_p10 = scmp.lt.u32.totalorder %s233_s3, %s1872_s2 }
  0xc8   : > { %p939_p6 = scmp.ne.s32.totalorder %s233_s3, %s938_s20  ;;  %p942_p11 = scmp.lt.u32.totalorder %s1467_s28, %s938_s20 }
  0xc9   : > { %p944_p1 = scmp.lt.u32.totalorder %s938_s20, %s233_s3 }
  0xca   : > { %p943_p12 = por %p942_p11, %p941_p10 }
  0xcc   : > { %p945_p2 = por %p944_p1, %p943_p12 }
  0xce   : > { %p946_p5 = pnand %p945_p2, %p939_p6 }
  0xd0   : > { %949 = shalt.err (!%p946_p5)  }
  0xd1   : > { %s950_s4 = scalar_lea.vmem %s243_s30, 16  ;;  %p955_p9 = scmp.lt.s32.totalorder %s243_s30, %s1438_s21 }
  0xd2   : > { %p951_p7 = scmp.ne.s32.totalorder %s243_s30, %s950_s4  ;;  %p956_p8 = scmp.lt.s32.totalorder %s1476_s22, %s950_s4 }
  0xd4   : > { %p957_p13 = por %p956_p8, %p955_p9 }
  0xd6   : > { %p958_p0 = pnand %p957_p13, %p951_p7 }
  0xd8   : > { %961 = shalt.err (!%p958_p0)  }
  0xd9   : > { %245 = dma.hbm_to_vmem [thread:$0]  %s233_s3, 16, %s243_s30, [#allocation4] }
  0xda   : > { %s1287_s13 = smov [#allocation2 + $0x6]   ;;  %s1887_s7 = sadd.s32 7, %s1430_s14 }
  0xdb   : > { %s258_s26 = sshll.u32 %s1287_s13, 4  ;;  %s1568_s19 = sld [smem:[#allocation6 + %s1887_s7]]  ;;  %s259_s26 = int_to_ptr.vmem [resolvable:$true] %s258_s26 }
  0xdc   : > { %s1888_s23 = sadd.s32 8, %s1430_s14  ;;  %s672_s11 = sshll.u32 %s1554_s25, 4 }
  0xdd   : > { %s1288_s6 = smov [#allocation2 + $0x7]   ;;  %s249_s30 = scalar_lea.hbm %s1872_s2, %s672_s11 }
  0xde   : > { %s274_s20 = sshll.u32 %s1288_s6, 4  ;;  %s962_s3 = scalar_lea.hbm %s249_s30, 16  ;;  %s1575_s20 = int_to_ptr.vmem [resolvable:$true] %s274_s20 }
  0xdf   : > { %p963_p3 = scmp.ne.s32.totalorder %s249_s30, %s962_s3  ;;  %p965_p4 = scmp.lt.u32.totalorder %s249_s30, %s1872_s2 }
  0xe0   : > { %p966_p6 = scmp.lt.u32.totalorder %s1467_s28, %s962_s3  ;;  %p968_p11 = scmp.lt.u32.totalorder %s962_s3, %s249_s30 }
  0xe2   : > { %p967_p10 = por %p966_p6, %p965_p4 }
  0xe4   : > { %p969_p12 = por %p968_p11, %p967_p10 }
  0xe6   : > { %p970_p1 = pnand %p969_p12, %p963_p3 }
  0xe8   : > { %973 = shalt.err (!%p970_p1)  }
  0xe9   : > { %s974_s25 = scalar_lea.vmem %s259_s26, 16  ;;  %p979_p5 = scmp.lt.s32.totalorder %s259_s26, %s1438_s21 }
  0xea   : > { %p975_p2 = scmp.ne.s32.totalorder %s259_s26, %s974_s25  ;;  %p980_p7 = scmp.lt.s32.totalorder %s1476_s22, %s974_s25 }
  0xec   : > { %p981_p9 = por %p980_p7, %p979_p5 }
  0xee   : > { %p982_p8 = pnand %p981_p9, %p975_p2 }
  0xf0   : > { %985 = shalt.err (!%p982_p8)  }
  0xf1   : > { %261 = dma.hbm_to_vmem [thread:$0]  %s249_s30, 16, %s259_s26, [#allocation4] }
  0xf2   : > { %s1585_s27 = sld [smem:[#allocation6 + %s1888_s23]]  ;;  %s673_s13 = sshll.u32 %s1568_s19, 4 }
  0xf3   : > { %s1289_s11 = smov [#allocation2 + $0x8]   ;;  %s265_s3 = scalar_lea.hbm %s1872_s2, %s673_s13 }
  0xf4   : > { %s291_s6 = sshll.u32 %s1289_s11, 4  ;;  %s986_s4 = scalar_lea.hbm %s265_s3, 16  ;;  %s1591_s6 = int_to_ptr.vmem [resolvable:$true] %s291_s6 }
  0xf5   : > { %p987_p13 = scmp.ne.s32.totalorder %s265_s3, %s986_s4  ;;  %p989_p0 = scmp.lt.u32.totalorder %s265_s3, %s1872_s2 }
  0xf6   : > { %p990_p3 = scmp.lt.u32.totalorder %s1467_s28, %s986_s4  ;;  %p992_p6 = scmp.lt.u32.totalorder %s986_s4, %s265_s3 }
  0xf8   : > { %p991_p4 = por %p990_p3, %p989_p0 }
  0xfa   : > { %p993_p10 = por %p992_p6, %p991_p4 }
  0xfc   : > { %p994_p11 = pnand %p993_p10, %p987_p13 }
  0xfe   : > { %997 = shalt.err (!%p994_p11)  }
  0xff   : > { %s998_s26 = scalar_lea.vmem %s1575_s20, 16  ;;  %p1003_p1 = scmp.lt.s32.totalorder %s1575_s20, %s1438_s21 }
 0x100   : > { %p999_p12 = scmp.ne.s32.totalorder %s1575_s20, %s998_s26  ;;  %p1004_p2 = scmp.lt.s32.totalorder %s1476_s22, %s998_s26 }
 0x102   : > { %p1005_p5 = por %p1004_p2, %p1003_p1 }
 0x104   : > { %p1006_p7 = pnand %p1005_p5, %p999_p12 }
 0x106   : > { %1009 = shalt.err (!%p1006_p7)  }
 0x107   : > { %277 = dma.hbm_to_vmem [thread:$0]  %s265_s3, 16, %s1575_s20, [#allocation4] }
 0x108   : > { %s1889_s7 = sadd.s32 9, %s1430_s14  ;;  %s1290_s30 = smov [#allocation2 + $0x9]  }
 0x109   : > { %s1606_s19 = sld [smem:[#allocation6 + %s1889_s7]]  ;;  %s307_s13 = sshll.u32 %s1290_s30, 4  ;;  %s1609_s13 = int_to_ptr.vmem [resolvable:$true] %s307_s13 }
 0x10a   : > { %s674_s11 = sshll.u32 %s1585_s27, 4  ;;  %s1894_s25 = sadd.s32 10, %s1430_s14 }
 0x10b   : > { %s281_s4 = scalar_lea.hbm %s1872_s2, %s674_s11 }
 0x10c   : > { %s1010_s26 = scalar_lea.hbm %s281_s4, 16  ;;  %p1013_p8 = scmp.lt.u32.totalorder %s281_s4, %s1872_s2 }
 0x10d   : > { %p1011_p9 = scmp.ne.s32.totalorder %s281_s4, %s1010_s26  ;;  %p1014_p13 = scmp.lt.u32.totalorder %s1467_s28, %s1010_s26 }
 0x10e   : > { %p1016_p3 = scmp.lt.u32.totalorder %s1010_s26, %s281_s4 }
 0x10f   : > { %p1015_p0 = por %p1014_p13, %p1013_p8 }
 0x111   : > { %p1017_p4 = por %p1016_p3, %p1015_p0 }
 0x113   : > { %p1018_p6 = pnand %p1017_p4, %p1011_p9 }
 0x115   : > { %1021 = shalt.err (!%p1018_p6)  }
 0x116   : > { %s1022_s20 = scalar_lea.vmem %s1591_s6, 16  ;;  %p1027_p11 = scmp.lt.s32.totalorder %s1591_s6, %s1438_s21 }
 0x117   : > { %p1023_p10 = scmp.ne.s32.totalorder %s1591_s6, %s1022_s20  ;;  %p1028_p12 = scmp.lt.s32.totalorder %s1476_s22, %s1022_s20 }
 0x119   : > { %p1029_p1 = por %p1028_p12, %p1027_p11 }
 0x11b   : > { %p1030_p2 = pnand %p1029_p1, %p1023_p10 }
 0x11d   : > { %1033 = shalt.err (!%p1030_p2)  }
 0x11e   : > { %294 = dma.hbm_to_vmem [thread:$0]  %s281_s4, 16, %s1591_s6, [#allocation4 + $0x1] }
 0x11f   : > { %s1627_s15 = sld [smem:[#allocation6 + %s1894_s25]]  ;;  %s1291_s23 = smov [#allocation2 + $0xa]  }
 0x120   : > { %s323_s27 = sshll.u32 %s1291_s23, 4  ;;  %s1890_s3 = sadd.s32 11, %s1430_s14  ;;  %s1631_s27 = int_to_ptr.vmem [resolvable:$true] %s323_s27 }
 0x121   : > { %s675_s30 = sshll.u32 %s1606_s19, 4  ;;  %s1638_s26 = sld [smem:[#allocation6 + %s1890_s3]] }
 0x122   : > { %s298_s24 = scalar_lea.hbm %s1872_s2, %s675_s30 }
 0x123   : > { %s1034_s20 = scalar_lea.hbm %s298_s24, 16  ;;  %p1037_p7 = scmp.lt.u32.totalorder %s298_s24, %s1872_s2 }
 0x124   : > { %p1035_p5 = scmp.ne.s32.totalorder %s298_s24, %s1034_s20  ;;  %p1038_p9 = scmp.lt.u32.totalorder %s1467_s28, %s1034_s20 }
 0x125   : > { %p1040_p13 = scmp.lt.u32.totalorder %s1034_s20, %s298_s24 }
 0x126   : > { %p1039_p8 = por %p1038_p9, %p1037_p7 }
 0x128   : > { %p1041_p0 = por %p1040_p13, %p1039_p8 }
 0x12a   : > { %p1042_p3 = pnand %p1041_p0, %p1035_p5 }
 0x12c   : > { %1045 = shalt.err (!%p1042_p3)  }
 0x12d   : > { %s1046_s19 = scalar_lea.vmem %s1609_s13, 16  ;;  %p1051_p6 = scmp.lt.s32.totalorder %s1609_s13, %s1438_s21 }
 0x12e   : > { %p1047_p4 = scmp.ne.s32.totalorder %s1609_s13, %s1046_s19  ;;  %p1052_p10 = scmp.lt.s32.totalorder %s1476_s22, %s1046_s19 }
 0x130   : > { %p1053_p11 = por %p1052_p10, %p1051_p6 }
 0x132   : > { %p1054_p12 = pnand %p1053_p11, %p1047_p4 }
 0x134   : > { %1057 = shalt.err (!%p1054_p12)  }
 0x135   : > { %310 = dma.hbm_to_vmem [thread:$0]  %s298_s24, 16, %s1609_s13, [#allocation4 + $0x1] }
 0x136   : > { %s1891_s7 = sadd.s32 12, %s1430_s14  ;;  %s676_s4 = sshll.u32 %s1627_s15, 4 }
 0x137   : > { %s1292_s23 = smov [#allocation2 + $0xb]   ;;  %s314_s20 = scalar_lea.hbm %s1872_s2, %s676_s4 }
 0x138   : > { %s339_s30 = sshll.u32 %s1292_s23, 4  ;;  %s1058_s6 = scalar_lea.hbm %s314_s20, 16  ;;  %s1655_s30 = int_to_ptr.vmem [resolvable:$true] %s339_s30 }
 0x139   : > { %p1059_p1 = scmp.ne.s32.totalorder %s314_s20, %s1058_s6  ;;  %p1061_p2 = scmp.lt.u32.totalorder %s314_s20, %s1872_s2 }
 0x13a   : > { %p1062_p5 = scmp.lt.u32.totalorder %s1467_s28, %s1058_s6  ;;  %p1064_p9 = scmp.lt.u32.totalorder %s1058_s6, %s314_s20 }
 0x13c   : > { %p1063_p7 = por %p1062_p5, %p1061_p2 }
 0x13e   : > { %p1065_p8 = por %p1064_p9, %p1063_p7 }
 0x140   : > { %p1066_p13 = pnand %p1065_p8, %p1059_p1 }
 0x142   : > { %1069 = shalt.err (!%p1066_p13)  }
 0x143   : > { %s1070_s13 = scalar_lea.vmem %s1631_s27, 16  ;;  %p1075_p3 = scmp.lt.s32.totalorder %s1631_s27, %s1438_s21 }
 0x144   : > { %p1071_p0 = scmp.ne.s32.totalorder %s1631_s27, %s1070_s13  ;;  %p1076_p4 = scmp.lt.s32.totalorder %s1476_s22, %s1070_s13 }
 0x146   : > { %p1077_p6 = por %p1076_p4, %p1075_p3 }
 0x148   : > { %p1078_p10 = pnand %p1077_p6, %p1071_p0 }
 0x14a   : > { %1081 = shalt.err (!%p1078_p10)  }
 0x14b   : > { %326 = dma.hbm_to_vmem [thread:$0]  %s314_s20, 16, %s1631_s27, [#allocation4 + $0x1] }
 0x14c   : > { %s677_s15 = sshll.u32 %s1638_s26, 4  ;;  %s1670_s3 = sld [smem:[#allocation6 + %s1891_s7]] }
 0x14d   : > { %s330_s23 = scalar_lea.hbm %s1872_s2, %s677_s15 }
 0x14e   : > { %s1082_s11 = scalar_lea.hbm %s330_s23, 16  ;;  %p1085_p12 = scmp.lt.u32.totalorder %s330_s23, %s1872_s2 }
 0x14f   : > { %p1083_p11 = scmp.ne.s32.totalorder %s330_s23, %s1082_s11  ;;  %p1086_p1 = scmp.lt.u32.totalorder %s1467_s28, %s1082_s11 }
 0x150   : > { %p1088_p5 = scmp.lt.u32.totalorder %s1082_s11, %s330_s23 }
 0x151   : > { %p1087_p2 = por %p1086_p1, %p1085_p12 }
 0x153   : > { %p1089_p7 = por %p1088_p5, %p1087_p2 }
 0x155   : > { %p1090_p9 = pnand %p1089_p7, %p1083_p11 }
 0x157   : > { %1093 = shalt.err (!%p1090_p9)  }
 0x158   : > { %s1094_s27 = scalar_lea.vmem %s1655_s30, 16  ;;  %p1099_p13 = scmp.lt.s32.totalorder %s1655_s30, %s1438_s21 }
 0x159   : > { %p1095_p8 = scmp.ne.s32.totalorder %s1655_s30, %s1094_s27  ;;  %p1100_p0 = scmp.lt.s32.totalorder %s1476_s22, %s1094_s27 }
 0x15b   : > { %p1101_p3 = por %p1100_p0, %p1099_p13 }
 0x15d   : > { %p1102_p4 = pnand %p1101_p3, %p1095_p8 }
 0x15f   : > { %1105 = shalt.err (!%p1102_p4)  }
 0x160   : > { %342 = dma.hbm_to_vmem [thread:$0]  %s330_s23, 16, %s1655_s30, [#allocation4 + $0x1] }
 0x161   : > { %s1293_s26 = smov [#allocation2 + $0xc]   ;;  %s1892_s19 = sadd.s32 13, %s1430_s14 }
 0x162   : > { %s355_s20 = sshll.u32 %s1293_s26, 4  ;;  %s1688_s13 = sld [smem:[#allocation6 + %s1892_s19]]  ;;  %s356_s20 = int_to_ptr.vmem [resolvable:$true] %s355_s20 }
 0x163   : > { %s1893_s15 = sadd.s32 14, %s1430_s14  ;;  %s678_s24 = sshll.u32 %s1670_s3, 4 }
 0x164   : > { %s1294_s4 = smov [#allocation2 + $0xd]   ;;  %s346_s27 = scalar_lea.hbm %s1872_s2, %s678_s24 }
 0x165   : > { %s371_s11 = sshll.u32 %s1294_s4, 4  ;;  %s1106_s7 = scalar_lea.hbm %s346_s27, 16  ;;  %s1695_s11 = int_to_ptr.vmem [resolvable:$true] %s371_s11 }
 0x166   : > { %p1107_p6 = scmp.ne.s32.totalorder %s346_s27, %s1106_s7  ;;  %p1109_p10 = scmp.lt.u32.totalorder %s346_s27, %s1872_s2 }
 0x167   : > { %p1110_p11 = scmp.lt.u32.totalorder %s1467_s28, %s1106_s7  ;;  %p1112_p1 = scmp.lt.u32.totalorder %s1106_s7, %s346_s27 }
 0x169   : > { %p1111_p12 = por %p1110_p11, %p1109_p10 }
 0x16b   : > { %p1113_p2 = por %p1112_p1, %p1111_p12 }
 0x16d   : > { %p1114_p5 = pnand %p1113_p2, %p1107_p6 }
 0x16f   : > { %1117 = shalt.err (!%p1114_p5)  }
 0x170   : > { %s1118_s3 = scalar_lea.vmem %s356_s20, 16  ;;  %p1123_p9 = scmp.lt.s32.totalorder %s356_s20, %s1438_s21 }
 0x171   : > { %p1119_p7 = scmp.ne.s32.totalorder %s356_s20, %s1118_s3  ;;  %p1124_p8 = scmp.lt.s32.totalorder %s1476_s22, %s1118_s3 }
 0x173   : > { %p1125_p13 = por %p1124_p8, %p1123_p9 }
 0x175   : > { %p1126_p0 = pnand %p1125_p13, %p1119_p7 }
 0x177   : > { %1129 = shalt.err (!%p1126_p0)  }
 0x178   : > { %358 = dma.hbm_to_vmem [thread:$0]  %s346_s27, 16, %s356_s20, [#allocation4 + $0x1] }
 0x179   : > { %s1705_s26 = sld [smem:[#allocation6 + %s1893_s15]]  ;;  %s679_s7 = sshll.u32 %s1688_s13, 4 }
 0x17a   : > { %s1295_s24 = smov [#allocation2 + $0xe]   ;;  %s362_s30 = scalar_lea.hbm %s1872_s2, %s679_s7 }
 0x17b   : > { %s387_s4 = sshll.u32 %s1295_s24, 4  ;;  %s1130_s23 = scalar_lea.hbm %s362_s30, 16  ;;  %s1711_s4 = int_to_ptr.vmem [resolvable:$true] %s387_s4 }
 0x17c   : > { %p1131_p3 = scmp.ne.s32.totalorder %s362_s30, %s1130_s23  ;;  %p1133_p4 = scmp.lt.u32.totalorder %s362_s30, %s1872_s2 }
 0x17d   : > { %p1134_p6 = scmp.lt.u32.totalorder %s1467_s28, %s1130_s23  ;;  %p1136_p11 = scmp.lt.u32.totalorder %s1130_s23, %s362_s30 }
 0x17f   : > { %p1135_p10 = por %p1134_p6, %p1133_p4 }
 0x181   : > { %p1137_p12 = por %p1136_p11, %p1135_p10 }
 0x183   : > { %p1138_p1 = pnand %p1137_p12, %p1131_p3 }
 0x185   : > { %1141 = shalt.err (!%p1138_p1)  }
 0x186   : > { %s1142_s20 = scalar_lea.vmem %s1695_s11, 16  ;;  %p1147_p5 = scmp.lt.s32.totalorder %s1695_s11, %s1438_s21 }
 0x187   : > { %p1143_p2 = scmp.ne.s32.totalorder %s1695_s11, %s1142_s20  ;;  %p1148_p7 = scmp.lt.s32.totalorder %s1476_s22, %s1142_s20 }
 0x189   : > { %p1149_p9 = por %p1148_p7, %p1147_p5 }
 0x18b   : > { %p1150_p8 = pnand %p1149_p9, %p1143_p2 }
 0x18d   : > { %1153 = shalt.err (!%p1150_p8)  }
 0x18e   : > { %374 = dma.hbm_to_vmem [thread:$0]  %s362_s30, 16, %s1695_s11, [#allocation4 + $0x1] }
 0x18f   : > { %s1895_s19 = sadd.s32 15, %s1430_s14  ;;  %s1296_s27 = smov [#allocation2 + $0xf]  }
 0x190   : > { %s1726_s13 = sld [smem:[#allocation6 + %s1895_s19]]  ;;  %s403_s7 = sshll.u32 %s1296_s27, 4  ;;  %s1729_s7 = int_to_ptr.vmem [resolvable:$true] %s403_s7 }
 0x191   : > { %s680_s24 = sshll.u32 %s1705_s26, 4  ;;  %s1735_s3 = sld [smem:[#allocation7 + %s1430_s14]] }
 0x192   : > { %s378_s23 = scalar_lea.hbm %s1872_s2, %s680_s24 }
 0x193   : > { %s1154_s20 = scalar_lea.hbm %s378_s23, 16  ;;  %p1157_p0 = scmp.lt.u32.totalorder %s378_s23, %s1872_s2 }
 0x194   : > { %p1155_p13 = scmp.ne.s32.totalorder %s378_s23, %s1154_s20  ;;  %p1158_p3 = scmp.lt.u32.totalorder %s1467_s28, %s1154_s20 }
 0x195   : > { %p1160_p6 = scmp.lt.u32.totalorder %s1154_s20, %s378_s23 }
 0x196   : > { %p1159_p4 = por %p1158_p3, %p1157_p0 }
 0x198   : > { %p1161_p10 = por %p1160_p6, %p1159_p4 }
 0x19a   : > { %p1162_p11 = pnand %p1161_p10, %p1155_p13 }
 0x19c   : > { %1165 = shalt.err (!%p1162_p11)  }
 0x19d   : > { %s1166_s11 = scalar_lea.vmem %s1711_s4, 16  ;;  %p1171_p1 = scmp.lt.s32.totalorder %s1711_s4, %s1438_s21 }
 0x19e   : > { %p1167_p12 = scmp.ne.s32.totalorder %s1711_s4, %s1166_s11  ;;  %p1172_p2 = scmp.lt.s32.totalorder %s1476_s22, %s1166_s11 }
 0x1a0   : > { %p1173_p5 = por %p1172_p2, %p1171_p1 }
 0x1a2   : > { %p1174_p7 = pnand %p1173_p5, %p1167_p12 }
 0x1a4   : > { %1177 = shalt.err (!%p1174_p7)  }
 0x1a5   : > { %390 = dma.hbm_to_vmem [thread:$0]  %s378_s23, 16, %s1711_s4, [#allocation4 + $0x1] }
 0x1a6   : > { %s1917_s25 = sadd.s32 1, %s1430_s14  ;;  %s1918_s26 = sadd.s32 2, %s1430_s14 }
 0x1a7   : > { %s1749_s15 = sld [smem:[#allocation7 + %s1917_s25]]  ;;  %s1919_s27 = sadd.s32 3, %s1430_s14 }
 0x1a8   : > { %s1753_s30 = sld [smem:[#allocation7 + %s1918_s26]]  ;;  %s1920_s29 = sadd.s32 4, %s1430_s14 }
 0x1a9   : > { %s1757_s24 = sld [smem:[#allocation7 + %s1919_s27]]  ;;  %s681_s20 = sshll.u32 %s1726_s13, 4 }
 0x1aa   : > { %s1761_s6 = sld [smem:[#allocation7 + %s1920_s29]]  ;;  %s1921_s11 = sadd.s32 5, %s1430_s14 }
 0x1ab   : > { %s1766_s19 = sld [smem:[#allocation7 + %s1921_s11]]  ;;  %s394_s4 = scalar_lea.hbm %s1872_s2, %s681_s20 }
 0x1ac   : > { %s1922_s23 = sadd.s32 6, %s1430_s14  ;;  %s1178_s17 = scalar_lea.hbm %s394_s4, 16 }
 0x1ad   : > { %s1773_s25 = sld [smem:[#allocation7 + %s1922_s23]]  ;;  %p1179_p9 = scmp.ne.s32.totalorder %s394_s4, %s1178_s17 }
 0x1ae   : > { %p1181_p8 = scmp.lt.u32.totalorder %s394_s4, %s1872_s2  ;;  %p1182_p13 = scmp.lt.u32.totalorder %s1467_s28, %s1178_s17 }
 0x1af   : > { %p1184_p3 = scmp.lt.u32.totalorder %s1178_s17, %s394_s4 }
 0x1b0   : > { %p1183_p0 = por %p1182_p13, %p1181_p8 }
 0x1b2   : > { %p1185_p4 = por %p1184_p3, %p1183_p0 }
 0x1b4   : > { %p1186_p6 = pnand %p1185_p4, %p1179_p9 }
 0x1b6   : > { %1189 = shalt.err (!%p1186_p6)  }
 0x1b7   : > { %s1190_s1 = scalar_lea.vmem %s1729_s7, 16  ;;  %p1195_p11 = scmp.lt.s32.totalorder %s1729_s7, %s1438_s21 }
 0x1b8   : > { %p1191_p10 = scmp.ne.s32.totalorder %s1729_s7, %s1190_s1  ;;  %p1196_p12 = scmp.lt.s32.totalorder %s1476_s22, %s1190_s1 }
 0x1ba   : > { %p1197_p1 = por %p1196_p12, %p1195_p11 }
 0x1bc   : > { %p1198_p2 = pnand %p1197_p1, %p1191_p10 }
 0x1be   : > { %1201 = shalt.err (!%p1198_p2)  }
 0x1bf   : > { %406 = dma.hbm_to_vmem [thread:$0]  %s394_s4, 16, %s1729_s7, [#allocation4 + $0x1] }
 0x1c0   : > { %s1923_s0 = sadd.s32 7, %s1430_s14  ;;  %s408_s17 = scalar_lea.vmem [#allocation8], %s1735_s3 }
 0x1c1   : > { %s435_s12 = sld [smem:[#allocation7 + %s1923_s0]]  ;;  %v409_v2 = vld [vmem:[%s408_s17] sm:$0x1]  ;;  %s412_s21 = scalar_lea.vmem [#allocation8], %s1749_s15 }
 0x1c2   : > { %410 = vst [vmem:[#allocation3] sm:$0x1] %v409_v2  ;;  %v413_v3 = vld [vmem:[%s412_s21] sm:$0x1]  ;;  %s416_s28 = scalar_lea.vmem [#allocation8], %s1753_s30  ;;  %s420_s22 = scalar_lea.vmem [#allocation8], %s1757_s24 }
 0x1c3   : > { %v417_v4 = vld [vmem:[%s416_s28] sm:$0x1]  ;;  %414 = vst [vmem:[#allocation3 + $0x1] sm:$0x1] %v413_v3  ;;  %s424_s13 = scalar_lea.vmem [#allocation8], %s1761_s6  ;;  %s428_s7 = scalar_lea.vmem [#allocation8], %s1766_s19 }
 0x1c4   : > { %418 = vst [vmem:[#allocation3 + $0x2] sm:$0x1] %v417_v4  ;;  %v421_v5 = vld [vmem:[%s420_s22] sm:$0x1]  ;;  %s432_s3 = scalar_lea.vmem [#allocation8], %s1773_s25  ;;  %s1795_s15 = scalar_lea.vmem [#allocation11], %s1434_s18 }
 0x1c5   : > { %v425_v6 = vld [vmem:[%s424_s13] sm:$0x1]  ;;  %422 = vst [vmem:[#allocation3 + $0x3] sm:$0x1] %v421_v5 }
 0x1c6   : > { %426 = vst [vmem:[#allocation3 + $0x4] sm:$0x1] %v425_v6  ;;  %v429_v7 = vld [vmem:[%s428_s7] sm:$0x1] }
 0x1c7   : > { %430 = vst [vmem:[#allocation3 + $0x5] sm:$0x1] %v429_v7  ;;  %v433_v8 = vld [vmem:[%s432_s3] sm:$0x1]  ;;  %s436_s27 = scalar_lea.vmem [#allocation8], %s435_s12 }
 0x1c8   : > { %434 = vst [vmem:[#allocation3 + $0x6] sm:$0x1] %v433_v8  ;;  %v437_v9 = vld [vmem:[%s436_s27] sm:$0x1] }
 0x1c9   : > { %438 = vst [vmem:[#allocation3 + $0x7] sm:$0x1] %v437_v9 }
 0x1ca   : > { %1252 = dma.done.wait [#allocation4], 128 }
 0x1cb   : > { %1253 = vsyncadd [#allocation4], 4294967168  ;;  %s1924_s30 = sadd.s32 8, %s1430_s14  ;;  %s1925_s24 = sadd.s32 9, %s1430_s14  ;;  %v442_v10 = vld [vmem:[#allocation2] sm:$0xff] }
 0x1cc   : > { %s469_s19 = sld [smem:[#allocation7 + %s1924_s30]]  ;;  %s1926_s6 = sadd.s32 10, %s1430_s14 }
 0x1cd   : > { %s473_s29 = sld [smem:[#allocation7 + %s1925_s24]]  ;;  %s1927_s11 = sadd.s32 11, %s1430_s14 }
 0x1ce   : > { %s477_s20 = sld [smem:[#allocation7 + %s1926_s6]]  ;;  %s1928_s18 = sadd.s32 12, %s1430_s14 }
 0x1cf   : > { %s481_s4 = sld [smem:[#allocation7 + %s1927_s11]]  ;;  %s1929_s25 = sadd.s32 13, %s1430_s14 }
 0x1d0   : > { %s485_s23 = sld [smem:[#allocation7 + %s1928_s18]]  ;;  %s1930_s1 = sadd.s32 14, %s1430_s14  ;;  %v443_v11 = vld [vmem:[#allocation3] sm:$0xff] }
 0x1d1   : > { %s489_s26 = sld [smem:[#allocation7 + %s1929_s25]]  ;;  %s1931_s12 = sadd.s32 15, %s1430_s14  ;;  %v444_v14 = vadd.f32 %v443_v11, %v442_v10 }
 0x1d2   : > { %s493_s0 = sld [smem:[#allocation7 + %s1930_s1]]  ;;  %s470_s21 = scalar_lea.vmem [#allocation8], %s469_s19 }
 0x1d3   : > { %s497_s17 = sld [smem:[#allocation7 + %s1931_s12]]  ;;  %v471_v12 = vld [vmem:[%s470_s21] sm:$0x1]  ;;  %s474_s28 = scalar_lea.vmem [#allocation8], %s473_s29  ;;  %445 = vadd.xlane.f32.xlu0 %v444_v14  ;;  %v448_v19 = vmul.f32 %v444_v14, %v444_v14 }
 0x1d4   : > { %v475_v13 = vld [vmem:[%s474_s28] sm:$0x1]  ;;  %472 = vst [vmem:[#allocation3 + $0x8] sm:$0x1] %v471_v12  ;;  %s478_s22 = scalar_lea.vmem [#allocation8], %s477_s20 }
 0x1d5   : > { %476 = vst [vmem:[#allocation3 + $0x9] sm:$0x1] %v475_v13  ;;  %v479_v15 = vld [vmem:[%s478_s22] sm:$0x1]  ;;  %s482_s13 = scalar_lea.vmem [#allocation8], %s481_s4 }
 0x1d6   : > { %v483_v16 = vld [vmem:[%s482_s13] sm:$0x1]  ;;  %480 = vst [vmem:[#allocation3 + $0xa] sm:$0x1] %v479_v15  ;;  %s486_s7 = scalar_lea.vmem [#allocation8], %s485_s23 }
 0x1d7   : > { %484 = vst [vmem:[#allocation3 + $0xb] sm:$0x1] %v483_v16  ;;  %v487_v17 = vld [vmem:[%s486_s7] sm:$0x1]  ;;  %s490_s3 = scalar_lea.vmem [#allocation8], %s489_s26  ;;  %449 = vadd.xlane.f32.xlu0 %v448_v19 }
 0x1d8   : > { %v491_v18 = vld [vmem:[%s490_s3] sm:$0x1]  ;;  %488 = vst [vmem:[#allocation3 + $0xc] sm:$0x1] %v487_v17  ;;  %s494_s14 = scalar_lea.vmem [#allocation8], %s493_s0 }
 0x1d9   : > { %492 = vst [vmem:[#allocation3 + $0xd] sm:$0x1] %v491_v18  ;;  %v495_v20 = vld [vmem:[%s494_s14] sm:$0x1]  ;;  %s498_s27 = scalar_lea.vmem [#allocation8], %s497_s17 }
 0x1da   : > { %v499_v21 = vld [vmem:[%s498_s27] sm:$0x1]  ;;  %496 = vst [vmem:[#allocation3 + $0xe] sm:$0x1] %v495_v20 }
 0x1db   : > { %500 = vst [vmem:[#allocation3 + $0xf] sm:$0x1] %v499_v21 }
 0x260   : > { %v446_v22 = vpop.xlane.xlu0 %445 }
 0x261   : > { %v447_v23 = vmul.f32 0.0078125, %v446_v22 }
 0x263   : > { %v452_v25 = vmul.f32 %v447_v23, %v447_v23  ;;  %v454_v29 = vsub.f32 %v444_v14, %v447_v23 }
 0x264   : > { %v450_v24 = vpop.xlane.xlu0 %449 }
 0x265   : > { %v451_v26 = vmul.f32 0.0078125, %v450_v24 }
 0x267   : > { %v453_v27 = vsub.f32 %v451_v26, %v452_v25 }
 0x269   : > { %v455_v28 = vadd.f32 1e-05, %v453_v27 }
 0x26b   : > { %764 = vrsqrt.f32 %v455_v28 }
 0x275   : > { %v765_v30 = vpop.eup %764 }
 0x276   : > { %v457_v31 = vmul.f32 %v765_v30, %v454_v29 }
 0x278   : > { %v462_v32 = vmul.f32 %v1452_v0, %v457_v31 }
 0x27a   : > { %v467_v33 = vadd.f32 %v1457_v1, %v462_v32 }
 0x27c   : > { %468 = vst [vmem:[%s1795_s15] sm:$0xff] %v467_v33 }
 0x27d   : > { %1254 = dma.done.wait [#allocation4 + $0x1], 128 }
 0x27e   : > { %1255 = vsyncadd [#allocation4 + $0x1], 4294967168  ;;  %v503_v34 = vld [vmem:[#allocation2 + $0x8] sm:$0xff]  ;;  %v504_v35 = vld [vmem:[#allocation3 + $0x8] sm:$0xff]  ;;  %s691_s30 = sshll.u32 %s1366_s10, 8  ;;  %s536_s19 = sshll.u32 %s1795_s15, 4  ;;  %s1824_s19 = int_to_ptr.vmem [resolvable:$true] %s536_s19 }
 0x27f   : > { %v505_v36 = vadd.f32 %v504_v35, %v503_v34  ;;  %s1822_s6 = scalar_lea.hbm %s1875_s5, %s691_s30  ;;  %s1932_s20 = sand.u32 1, %s1266_s8  }
 0x280   : > { %s1830_s11 = scalar_lea.sflag [#allocation10], %s1932_s20  ;;  %s1202_s10 = scalar_lea.vmem %s1824_s19, 256 }
 0x281   : > { %506 = vadd.xlane.f32.xlu0 %v505_v36  ;;  %v509_v37 = vmul.f32 %v505_v36, %v505_v36  ;;  %p1203_p5 = scmp.ne.s32.totalorder %s1824_s19, %s1202_s10  ;;  %p1933_p7 = scmp.ne.s32.totalorder %s1907_s16, 0 }
 0x282   : > { %s1297_s4 = smov [#allocation11]  }
 0x283   : > { %p1204_p9 = pnand %p1203_p5, %p1933_p7  ;;  %s1206_s18 = sshll.u32 %s1297_s4, 4  ;;  %s1207_s18 = int_to_ptr.vmem [resolvable:$false] %s1206_s18 }
 0x284   : > { %s1208_s23 = scalar_lea.vmem %s1207_s18, 512  ;;  %p1209_p13 = scmp.lt.s32.totalorder %s1824_s19, %s1207_s18 }
 0x285   : > { %510 = vadd.xlane.f32.xlu0 %v509_v37  ;;  %p1205_p8 = pneg %p1204_p9  ;;  %p1210_p0 = scmp.lt.s32.totalorder %s1208_s23, %s1202_s10 }
 0x287   : > { %p1211_p3 = por %p1210_p0, %p1209_p13 }
 0x289   : > { %p1212_p4 = pnand %p1211_p3, %p1205_p8 }
 0x30e   : > { %v507_v38 = vpop.xlane.xlu0 %506 }
 0x30f   : > { %v508_v39 = vmul.f32 0.0078125, %v507_v38 }
 0x311   : > { %v513_v41 = vmul.f32 %v508_v39, %v508_v39  ;;  %v515_v45 = vsub.f32 %v505_v36, %v508_v39 }
 0x312   : > { %v511_v40 = vpop.xlane.xlu0 %510 }
 0x313   : > { %v512_v42 = vmul.f32 0.0078125, %v511_v40 }
 0x315   : > { %v514_v43 = vsub.f32 %v512_v42, %v513_v41 }
 0x317   : > { %v516_v44 = vadd.f32 1e-05, %v514_v43 }
 0x319   : > { %766 = vrsqrt.f32 %v516_v44 }
 0x323   : > { %v767_v46 = vpop.eup %766 }
 0x324   : > { %v518_v47 = vmul.f32 %v767_v46, %v515_v45 }
 0x326   : > { %v519_v48 = vmul.f32 %v1452_v0, %v518_v47 }
 0x328   : > { %v520_v49 = vadd.f32 %v1457_v1, %v519_v48 }
 0x32a   : > { %521 = vst [vmem:[%s1795_s15 + $0x8] sm:$0xff] %v520_v49 }
 0x32b   : > { %1215 = shalt.err (!%p1212_p4)
}
 0x32c   : > { %s1216_s15 = scalar_lea.hbm %s1822_s6, 256  ;;  %s1220_s1 = scalar_lea.hbm %s1875_s5, 512 }
 0x32d   : > { %p1217_p6 = scmp.ne.s32.totalorder %s1822_s6, %s1216_s15  ;;  %p1221_p12 = scmp.lt.u32.totalorder %s1822_s6, %s1875_s5 }
 0x32e   : > { %p1222_p1 = scmp.lt.u32.totalorder %s1220_s1, %s1216_s15  ;;  %p1224_p5 = scmp.lt.u32.totalorder %s1216_s15, %s1822_s6 }
 0x32f   : > { %p1218_p10 = pnand %p1217_p6, %p1933_p7 }
 0x330   : > { %p1223_p2 = por %p1222_p1, %p1221_p12 }
 0x331   : > { %p1219_p11 = pneg %p1218_p10 }
 0x332   : > { %p1225_p9 = por %p1224_p5, %p1223_p2 }
 0x334   : > { %p1226_p8 = pnand %p1225_p9, %p1219_p11 }
 0x336   : > { %1229 = shalt.err (!%p1226_p8)
}
 0x337   : > { %s1298_s17 = smov 128   ;;  %s1299_s21 = smov 8  }
 0x338   : > { %696 = dma.vmem_to_hbm [thread:$0]  (%p1933_p7), %s1824_s19, 256, %s1822_s6, %s1830_s11, %s1298_s17, %s1298_s17, %s1299_s21  }
 0x339 PF: > { %s1934_s28 = sld [smem:[#allocation51_spill]]  ;;  %s1935_s22 = sld [smem:[#allocation55_spill]] }
 0x33a   : > { %p708_p13 = scmp.ge.s32.totalorder %s1274_s9, 2 }
 0x33f   : > { %s551_s13 = sand.u32 1, %s1934_s28   ;;  %p1936_p0 = scmp.ne.s32.totalorder %s1935_s22, 0 }
 0x340   : > { %s552_s7 = scalar_lea.sflag [#allocation10], %s551_s13 }
 0x341   : > { %p703_p3 = pnand %p708_p13, %p1936_p0 }
 0x343   : > { %1257 = dma.done.wait (!%p703_p3), %s552_s7, 256  }
 0x344   : > { %1259 = vsyncadd (!%p703_p3), %s552_s7, 4294967040  ;;  %s1937_s9 = sld [smem:[#allocation53_spill]]  ;;  %s1938_s3 = sld [smem:[#allocation52_spill]] }
 0x345   : > { %s1939_s1 = sld [smem:[#allocation54_spill]]  ;;  %s1940_s0 = smov %s1266_s8 }
 0x34a   : > { %p24_p4 = scmp.ge.s32.totalorder %s1937_s9, 4   ;;  %s1941_s8 = smov %s1938_s3 }
 0x34c   :  { %26 = sbr.rel (!%p24_p4) target bundleno = 27 (0x1b), region = 178 }
 0x353   :  { %557 = vsyncpa [#allocation9], 1 }
 0x354   :  { %559 = vsyncpa [#allocation9 + $0x1], 1 }
 0x355   :  { %560 = vsyncpa [#allocation10], 1 }
 0x356   :  { %562 = vsyncpa [#allocation10 + $0x1], 1 }
 0x357   :  { %563 = vsyncmov [#allocation4] }
 0x35a   :  { %s564_s16 = vpop.sfrf %563 }
 0x35b   :  { %p689_p7 = scmp.ne.s32.totalorder %s564_s16, 0 }
 0x35d   :  { %568 = shalt.err (%p689_p7)  }
 0x35e   :  { %570 = vsyncmov [#allocation4 + $0x1] }
 0x361   :  { %s571_s14 = vpop.sfrf %570 }
 0x362   :  { %p690_p6 = scmp.ne.s32.totalorder %s571_s14, 0 }
 0x364   :  { %575 = shalt.err (%p690_p6)  }

</bundles_post_ra>
